<compile_context>
chip_gen: v5e
topology: v5e:2x2
jax: 0.10.0
libtpu: 0.0.40
codegen_flags: <defaults>
</compile_context>

<pallas_src>
import functools
import math

import numpy as np
import jax
import jax.numpy as jnp
from jax.experimental import pallas as pl
from jax.experimental.pallas import tpu as pltpu


def _block_view_max(feat_ref, n_views):
    """Max over the leading (view) axis of an (n_views, C, HW) VMEM tile, slab by slab."""
    xm = feat_ref[0]
    for i in range(1, n_views):
        xm = jnp.maximum(xm, feat_ref[i])
    return xm


def _epilogue(xm_f32, w_cc_ref, b_c_ref, heads_w_ref, consts_ref, action_ref, out_ref,
              action_dim, has_action):
    """conv1x1+ReLU -> spatial amax -> fc+ReLU -> fused heads -> packed (1, OUT_PAD) row."""
    A = action_dim
    conv_w = w_cc_ref[0]                     # (C, C)   (C_out, C_in)
    fc_w = w_cc_ref[1]                       # (C, C)   (C_out, C_in) torch layout
    conv_b = b_c_ref[:, 0:1]                 # (C, 1)
    fc_b = b_c_ref[:, 1:2]                   # (C, 1)

    # 1x1 conv in native NCHW orientation: (C_out, C_in) @ (C_in, HW) — one MXU matmul.
    h = jnp.dot(conv_w, xm_f32, preferred_element_type=jnp.float32) + conv_b
    h = jnp.maximum(h, 0.0)                                  # (C, HW)

    # spatial amax over the lane axis -> (C, 1) column
    pooled = jnp.max(h, axis=1, keepdims=True)

    # fc + fused heads in column orientation (no O(C^2) relayout in hidden_dim)
    f = jnp.dot(fc_w, pooled, preferred_element_type=jnp.float32) + fc_b
    f = jnp.maximum(f, 0.0)                                  # (C, 1)
    head_col = jnp.dot(heads_w_ref[...], f,
                       preferred_element_type=jnp.float32)   # (OUT_PAD, 1)

    # (OUT_PAD, 1) column -> (1, OUT_PAD) lane-dense row via diag mask + sublane SUM
    # (0-fill + sum is exact regardless of sign; cost fixed at 128x128, independent of C).
    out_w = head_col.shape[0]
    rows = jax.lax.broadcasted_iota(jnp.int32, (out_w, out_w), 0)
    cols = jax.lax.broadcasted_iota(jnp.int32, (out_w, out_w), 1)
    head = jnp.sum(jnp.where(rows == cols,
                             jnp.broadcast_to(head_col, (out_w, out_w)), 0.0),
                   axis=0, keepdims=True)                    # (1, OUT_PAD)
    head = head + consts_ref[0:1, :]                         # fused heads bias

    mean = pl.reciprocal(1.0 + jnp.exp(-head), approx=False)  # sigmoid (exp on EUP)
    lane = jax.lax.broadcasted_iota(jnp.int32, head.shape, 1)
    if has_action:
        a = action_ref[...]                                  # (1, OUT_PAD): action at [0:A] and [A:2A]
        d = a - mean
        lp = -(d * d) * consts_ref[1:2, :] + consts_ref[2:3, :]   # Normal.log_prob (consts hoisted)
        first, second = a, lp
    else:
        first, second = mean, jnp.zeros_like(head)           # action = mean, log_prob = log(1) = 0

    packed = jnp.where(lane < A, first,
              jnp.where(lane < 2 * A, second,
               jnp.where(lane == 2 * A, head, 0.0)))
    out_ref[...] = packed                                    # one lane-dense (1, OUT_PAD) store


def camcontrol_kernel(feat_ref, w_cc_ref, b_c_ref, heads_w_ref, consts_ref, *rest,
                      action_dim, has_action, blocked, views_per_block):
    if has_action:
        action_ref = rest[0]
        rest = rest[1:]
    else:
        action_ref = None

    if blocked:
        out_ref, max_acc = rest
        n = pl.program_id(1)

        @pl.when(n == 0)
        def _():
            max_acc[...] = jnp.full(max_acc.shape, -jnp.inf, max_acc.dtype)

        # running max over view blocks (native feat dtype; max is exact in bf16)
        max_acc[...] = jnp.maximum(max_acc[...],
                                   _block_view_max(feat_ref, views_per_block))

        @pl.when(n == pl.num_programs(1) - 1)
        def _():
            _epilogue(max_acc[...].astype(jnp.float32), w_cc_ref, b_c_ref, heads_w_ref,
                      consts_ref, action_ref, out_ref, action_dim, has_action)
    else:
        # single view block: no scratch, no pl.when gating
        (out_ref,) = rest
        xm = _block_view_max(feat_ref, views_per_block).astype(jnp.float32)
        _epilogue(xm, w_cc_ref, b_c_ref, heads_w_ref, consts_ref,
                  action_ref, out_ref, action_dim, has_action)


def _repack_params(params, C, A, OUT_PAD):
    conv_w = params['conv_w'].reshape(C, C).astype(jnp.float32)   # (C_out, C_in)
    fc_w = params['fc_w'].astype(jnp.float32)                     # (C_out, C_in) torch layout
    w_cc = jnp.stack([conv_w, fc_w], axis=0)                      # (2, C, C)

    b_c = jnp.stack([params['conv_b'].astype(jnp.float32),
                     params['fc_b'].astype(jnp.float32)], axis=1)  # (C, 2)

    ah_w = params['ah_w'].astype(jnp.float32)                     # (A, C)
    ah_b = params['ah_b'].astype(jnp.float32)
    vh_w = params['vh_w'].astype(jnp.float32)                     # (1, C)
    vh_b = params['vh_b'].astype(jnp.float32)
    log_std = params['log_std'].astype(jnp.float32)

    # fused heads (column-major): rows [0:A] & [A:2A] = action logits, row 2A = value
    heads_w = jnp.zeros((OUT_PAD, C), jnp.float32)
    heads_w = heads_w.at[0:A, :].set(ah_w)
    heads_w = heads_w.at[A:2 * A, :].set(ah_w)
    heads_w = heads_w.at[2 * A, :].set(vh_w[0])

    heads_b = jnp.zeros((OUT_PAD,), jnp.float32)
    heads_b = heads_b.at[0:A].set(ah_b).at[A:2 * A].set(ah_b).at[2 * A].set(vh_b[0])
    # hoisted Normal.log_prob constants: lp = -(a-mean)^2 * inv_two_var + lp_const
    inv_two_var = jnp.zeros((OUT_PAD,), jnp.float32).at[A:2 * A].set(
        0.5 * jnp.exp(-2.0 * log_std))
    lp_const = jnp.zeros((OUT_PAD,), jnp.float32).at[A:2 * A].set(
        -log_std - 0.5 * math.log(2.0 * math.pi))
    consts = jnp.stack([heads_b, inv_two_var, lp_const], axis=0)   # (3, OUT_PAD)
    return w_cc, b_c, heads_w, consts


@functools.partial(jax.jit, static_argnames=('max_tile_bytes',))
def cam_control_forward(feat_nchw, params, action=None, *, max_tile_bytes=4 * 1024 * 1024):
    """feat_nchw: (B, N, C, H, W) float32/bfloat16. Returns (log_prob, state_value, action)."""
    B, N, C, H, W = feat_nchw.shape
    A = int(params['log_std'].shape[0])
    HW = H * W
    OUT_PAD = 128 * ((2 * A + 1 + 127) // 128)
    has_action = action is not None

    # native layout & dtype; merging H,W is a free contiguous reshape
    feat = feat_nchw.reshape(B, N, C, HW)

    w_cc, b_c, heads_w, consts = _repack_params(params, C, A, OUT_PAD)

    # views per grid step: largest divisor of N whose feat tile fits the tile budget
    view_bytes = C * HW * feat.dtype.itemsize
    tile_target = max(int(max_tile_bytes), view_bytes)
    n_blk = 1
    for d in range(1, N + 1):
        if N % d == 0 and d * view_bytes <= tile_target:
            n_blk = d
    nb = N // n_blk
    blocked = nb > 1

    if blocked:
        grid = (B, nb)
        dims = ("parallel", "arbitrary")
        feat_idx = lambda b, n: (b, n, 0, 0)
        c3_idx = lambda b, n: (0, 0, 0)
        c2_idx = lambda b, n: (0, 0)
        pb_idx = lambda b, n: (b, 0, 0)
        scratch = [pltpu.VMEM((C, HW), feat.dtype)]       # running max over view blocks
    else:
        grid = (B,)
        dims = ("parallel",)
        feat_idx = lambda b: (b, 0, 0, 0)
        c3_idx = lambda b: (0, 0, 0)
        c2_idx = lambda b: (0, 0)
        pb_idx = lambda b: (b, 0, 0)
        scratch = []

    operands = [feat, w_cc, b_c, heads_w, consts]
    in_specs = [
        pl.BlockSpec((None, n_blk, C, HW), feat_idx),     # feat tile (n_blk, C, HW)
        pl.BlockSpec((2, C, C), c3_idx),                  # conv_w / fc_w (resident)
        pl.BlockSpec((C, 2), c2_idx),                     # conv_b / fc_b
        pl.BlockSpec((OUT_PAD, C), c2_idx),               # fused heads weight
        pl.BlockSpec((3, OUT_PAD), c2_idx),               # heads_b / inv_two_var / lp_const
    ]
    if has_action:
        a = jnp.asarray(action, jnp.float32).reshape(B, A)
        action_in = jnp.zeros((B, 1, OUT_PAD), jnp.float32)
        action_in = action_in.at[:, 0, 0:A].set(a).at[:, 0, A:2 * A].set(a)
        operands.append(action_in)
        in_specs.append(pl.BlockSpec((None, 1, OUT_PAD), pb_idx))

    kernel = functools.partial(camcontrol_kernel, action_dim=A, has_action=has_action,
                               blocked=blocked, views_per_block=n_blk)

    tile_bytes = n_blk * view_bytes
    vmem_limit = int(min(48 * 1024 * 1024,
                         max(32 * 1024 * 1024, 2 * tile_bytes + 8 * 1024 * 1024)))

    packed = pl.pallas_call(
        kernel,
        out_shape=jax.ShapeDtypeStruct((B, 1, OUT_PAD), jnp.float32),
        grid_spec=pltpu.PrefetchScalarGridSpec(
            num_scalar_prefetch=0,
            grid=grid,
            in_specs=in_specs,
            out_specs=pl.BlockSpec((None, 1, OUT_PAD), pb_idx),
            scratch_shapes=scratch),
        compiler_params=pltpu.CompilerParams(
            dimension_semantics=dims,
            vmem_limit_bytes=vmem_limit),
    )(*operands)

    action_out = packed[:, 0, 0:A]
    log_prob = packed[:, 0, A:2 * A]
    state_value = packed[:, 0, 2 * A:2 * A + 1]
    return log_prob, state_value, action_out


def init_params(key, hidden_dim, action_dim):
    k1, k2, k3, k4 = jax.random.split(key, 4)
    return {
        # Conv2d(hidden, hidden, 1): weight (Cout, Cin, 1, 1), bias (Cout,)
        'conv_w': 0.1 * jax.random.normal(k1, (hidden_dim, hidden_dim, 1, 1), jnp.float32),
        'conv_b': 0.01 * jax.random.normal(k2, (hidden_dim,), jnp.float32),
        # Linear(hidden, hidden)
        'fc_w': 0.1 * jax.random.normal(k3, (hidden_dim, hidden_dim), jnp.float32),
        'fc_b': 0.01 * jax.random.normal(k4, (hidden_dim,), jnp.float32),
        # action_head / value_head are zero-initialized in the module
        'ah_w': jnp.zeros((action_dim, hidden_dim), jnp.float32),
        'ah_b': jnp.zeros((action_dim,), jnp.float32),
        'vh_w': jnp.zeros((1, hidden_dim), jnp.float32),
        'vh_b': jnp.zeros((1,), jnp.float32),
        # log_std = -1.0 * ones(action_dim)
        'log_std': -1.0 * jnp.ones((action_dim,), jnp.float32),
    }


def reference_forward(feat_nchw, params, action=None):
    """Pure-JAX reference of the conv_base forward (for correctness check)."""
    B, N, C, H, W = feat_nchw.shape
    x = jnp.max(feat_nchw, axis=1)                                   # (B, C, H, W)
    w = params['conv_w'].reshape(C, C)
    h = jnp.einsum('oc,bchw->bohw', w, x) + params['conv_b'][None, :, None, None]
    h = jnp.maximum(h, 0.0)
    pooled = jnp.max(h, axis=(2, 3))                                 # (B, C)
    f = jnp.maximum(pooled @ params['fc_w'].T + params['fc_b'], 0.0)
    mean = jax.nn.sigmoid(f @ params['ah_w'].T + params['ah_b'])
    value = f @ params['vh_w'].T + params['vh_b']
    log_std = params['log_std'][None, :]
    if action is None:
        return jnp.zeros_like(mean), value, mean
    std = jnp.exp(log_std)
    lp = -((action - mean) ** 2) / (2 * std * std) - log_std - 0.5 * jnp.log(2 * jnp.pi)
    return lp, value, action


def _check(got, want, atol, name):
    got = np.asarray(got)
    want = np.asarray(want)
    assert np.allclose(got, want, atol=atol), (
        f"{name}: max abs diff {np.abs(got - want).max()}")


if __name__ == "__main__":
    # align XLA reference matmul precision with the kernel's f32 accumulation
    jax.config.update("jax_default_matmul_precision", "highest")

    B, N, C, H, W, A = 2, 4, 32, 8, 8, 4   # batch, views, hidden_dim, spatial, action_dim
    key = jax.random.PRNGKey(0)
    kf, ka, kp = jax.random.split(key, 3)
    feat = jax.random.normal(kf, (B, N, C, H, W), jnp.float32)
    given_action = jax.random.uniform(ka, (B, A), jnp.float32)
    params = init_params(kp, C, A)

    # path 1: action provided -> Normal log_prob in-kernel (single view-block path)
    lp, val, act = cam_control_forward(feat, params, action=given_action)
    jax.block_until_ready((lp, val, act))
    lp_r, val_r, act_r = reference_forward(feat, params, action=given_action)
    _check(lp, lp_r, 5e-4, "log_prob")
    _check(val, val_r, 5e-4, "value")
    _check(act, act_r, 5e-4, "action")

    # path 2: action=None, randomise=False -> action = mean, log_prob = 0
    lp2, val2, act2 = cam_control_forward(feat, params, action=None)
    jax.block_until_ready((lp2, val2, act2))
    lp2_r, val2_r, act2_r = reference_forward(feat, params, action=None)
    _check(lp2, lp2_r, 5e-4, "log_prob (det)")
    _check(val2, val2_r, 5e-4, "value (det)")
    _check(act2, act2_r, 5e-4, "action (det)")

    # path 3: non-zero head weights to exercise the fused-head packing
    k5, k6, k7, k8 = jax.random.split(jax.random.PRNGKey(1), 4)
    params2 = dict(params)
    params2['ah_w'] = 0.1 * jax.random.normal(k5, (A, C), jnp.float32)
    params2['ah_b'] = 0.01 * jax.random.normal(k6, (A,), jnp.float32)
    params2['vh_w'] = 0.1 * jax.random.normal(k7, (1, C), jnp.float32)
    params2['vh_b'] = 0.05 * jnp.ones((1,), jnp.float32)
    params2['log_std'] = -0.5 * jnp.ones((A,), jnp.float32) \
        + 0.1 * jax.random.normal(k8, (A,), jnp.float32)
    lp3, val3, act3 = cam_control_forward(feat, params2, action=given_action)
    jax.block_until_ready((lp3, val3, act3))
    lp3_r, val3_r, act3_r = reference_forward(feat, params2, action=given_action)
    _check(lp3, lp3_r, 5e-4, "log_prob (nonzero heads)")
    _check(val3, val3_r, 5e-4, "value (nonzero heads)")
    _check(act3, act3_r, 5e-4, "action (nonzero heads)")

    # path 4: force the multi view-block (running-max reduction) path
    lp4, val4, act4 = cam_control_forward(feat, params2, action=given_action,
                                          max_tile_bytes=1)
    jax.block_until_ready((lp4, val4, act4))
    _check(lp4, lp3_r, 5e-4, "log_prob (blocked views)")
    _check(val4, val3_r, 5e-4, "value (blocked views)")
    _check(act4, act3_r, 5e-4, "action (blocked views)")

    # path 5: bf16 feat streamed in native dtype (half HBM bytes in the hot loop)
    feat_bf16 = feat.astype(jnp.bfloat16)
    lp5, val5, act5 = cam_control_forward(feat_bf16, params2, action=given_action)
    jax.block_until_ready((lp5, val5, act5))
    lp5_r, val5_r, act5_r = reference_forward(feat_bf16.astype(jnp.float32), params2,
                                              action=given_action)
    _check(lp5, lp5_r, 1e-3, "log_prob (bf16 feat)")
    _check(val5, val5_r, 1e-3, "value (bf16 feat)")
    _check(act5, act5_r, 1e-3, "action (bf16 feat)")

    print("KERNEL_OK")
</pallas_src>

<mosaic_0001>
module attributes {stable_mosaic.version = 11 : i64} {
  func.func @camcontrol_kernel(%arg0: i32, %arg1: memref<1x4x32x64xf32, #tpu.memory_space<vmem>>, %arg2: memref<2x32x32xf32, #tpu.memory_space<vmem>>, %arg3: memref<32x2xf32, #tpu.memory_space<vmem>>, %arg4: memref<128x32xf32, #tpu.memory_space<vmem>>, %arg5: memref<3x128xf32, #tpu.memory_space<vmem>>, %arg6: memref<1x1x128xf32, #tpu.memory_space<vmem>>, %arg7: memref<1x1x128xf32, #tpu.memory_space<vmem>>) attributes {dimension_semantics = [#tpu.dimension_semantics<parallel>], iteration_bounds = array<i64: 2>, scalar_prefetch = 0 : i64, scratch_operands = 0 : i64, tpu.core_type = #tpu.core_type<tc>, window_params = [{transform_indices = @transform_0, window_bounds = array<i64: 1, 4, 32, 64>}, {pipeline_mode = #tpu.pipeline_mode<synchronous>, transform_indices = @transform_1, window_bounds = array<i64: 2, 32, 32>}, {pipeline_mode = #tpu.pipeline_mode<synchronous>, transform_indices = @transform_2, window_bounds = array<i64: 32, 2>}, {pipeline_mode = #tpu.pipeline_mode<synchronous>, transform_indices = @transform_3, window_bounds = array<i64: 128, 32>}, {pipeline_mode = #tpu.pipeline_mode<synchronous>, transform_indices = @transform_4, window_bounds = array<i64: 3, 128>}, {transform_indices = @transform_5, window_bounds = array<i64: 1, 1, 128>}, {transform_indices = @transform_6, window_bounds = array<i64: 1, 1, 128>}]} {
    %c0 = arith.constant 0 : index
    %c0_0 = arith.constant 0 : index
    %c0_1 = arith.constant 0 : index
    %c0_2 = arith.constant 0 : index
    %0 = vector.load %arg1[%c0, %c0_0, %c0_1, %c0_2] : memref<1x4x32x64xf32, #tpu.memory_space<vmem>>, vector<1x1x32x64xf32>
    %1 = vector.shape_cast %0 : vector<1x1x32x64xf32> to vector<32x64xf32>
    %c0_3 = arith.constant 0 : index
    %c1 = arith.constant 1 : index
    %c0_4 = arith.constant 0 : index
    %c0_5 = arith.constant 0 : index
    %2 = vector.load %arg1[%c0_3, %c1, %c0_4, %c0_5] : memref<1x4x32x64xf32, #tpu.memory_space<vmem>>, vector<1x1x32x64xf32>
    %3 = vector.shape_cast %2 : vector<1x1x32x64xf32> to vector<32x64xf32>
    %4 = arith.maximumf %1, %3 : vector<32x64xf32>
    %c0_6 = arith.constant 0 : index
    %c2 = arith.constant 2 : index
    %c0_7 = arith.constant 0 : index
    %c0_8 = arith.constant 0 : index
    %5 = vector.load %arg1[%c0_6, %c2, %c0_7, %c0_8] : memref<1x4x32x64xf32, #tpu.memory_space<vmem>>, vector<1x1x32x64xf32>
    %6 = vector.shape_cast %5 : vector<1x1x32x64xf32> to vector<32x64xf32>
    %7 = arith.maximumf %4, %6 : vector<32x64xf32>
    %c0_9 = arith.constant 0 : index
    %c3 = arith.constant 3 : index
    %c0_10 = arith.constant 0 : index
    %c0_11 = arith.constant 0 : index
    %8 = vector.load %arg1[%c0_9, %c3, %c0_10, %c0_11] : memref<1x4x32x64xf32, #tpu.memory_space<vmem>>, vector<1x1x32x64xf32>
    %9 = vector.shape_cast %8 : vector<1x1x32x64xf32> to vector<32x64xf32>
    %10 = arith.maximumf %7, %9 : vector<32x64xf32>
    %c0_12 = arith.constant 0 : index
    %c0_13 = arith.constant 0 : index
    %c0_14 = arith.constant 0 : index
    %11 = vector.load %arg2[%c0_12, %c0_13, %c0_14] : memref<2x32x32xf32, #tpu.memory_space<vmem>>, vector<1x32x32xf32>
    %12 = vector.shape_cast %11 : vector<1x32x32xf32> to vector<32x32xf32>
    %c1_15 = arith.constant 1 : index
    %c0_16 = arith.constant 0 : index
    %c0_17 = arith.constant 0 : index
    %13 = vector.load %arg2[%c1_15, %c0_16, %c0_17] : memref<2x32x32xf32, #tpu.memory_space<vmem>>, vector<1x32x32xf32>
    %14 = vector.shape_cast %13 : vector<1x32x32xf32> to vector<32x32xf32>
    %c0_18 = arith.constant 0 : index
    %c0_19 = arith.constant 0 : index
    %15 = vector.load %arg3[%c0_18, %c0_19] : memref<32x2xf32, #tpu.memory_space<vmem>>, vector<32x1xf32>
    %c0_20 = arith.constant 0 : index
    %c1_21 = arith.constant 1 : index
    %16 = vector.load %arg3[%c0_20, %c1_21] : memref<32x2xf32, #tpu.memory_space<vmem>>, vector<32x1xf32>
    %cst = arith.constant dense<0.000000e+00> : vector<32x64xf32>
    %17 = tpu.matmul %12, %10, %cst {dimension_numbers = #tpu.dot_dimension_numbers<[1], [0], [0], [1], [0, 0, 1, 1], [], []>, precision = #tpu.contract_precision<fp32>} : vector<32x32xf32>, vector<32x64xf32>, vector<32x64xf32> -> vector<32x64xf32>
    %18 = vector.broadcast %15 : vector<32x1xf32> to vector<32x64xf32>
    %19 = arith.addf %17, %18 : vector<32x64xf32>
    %cst_22 = arith.constant 0.000000e+00 : f32
    %20 = vector.broadcast %cst_22 : f32 to vector<32x64xf32>
    %21 = arith.maximumf %19, %20 : vector<32x64xf32>
    %cst_23 = arith.constant dense<0xFF800000> : vector<32xf32>
    %22 = vector.multi_reduction <maximumf>, %21, %cst_23 [1] : vector<32x64xf32> to vector<32xf32>
    %23 = vector.shape_cast %22 : vector<32xf32> to vector<32x1xf32>
    %cst_24 = arith.constant dense<0.000000e+00> : vector<32x1xf32>
    %24 = tpu.matmul %14, %23, %cst_24 {dimension_numbers = #tpu.dot_dimension_numbers<[1], [0], [0], [1], [0, 0, 1, 1], [], []>, precision = #tpu.contract_precision<fp32>} : vector<32x32xf32>, vector<32x1xf32>, vector<32x1xf32> -> vector<32x1xf32>
    %25 = arith.addf %24, %16 : vector<32x1xf32>
    %cst_25 = arith.constant 0.000000e+00 : f32
    %26 = vector.broadcast %cst_25 : f32 to vector<32x1xf32>
    %27 = arith.maximumf %25, %26 : vector<32x1xf32>
    %c0_26 = arith.constant 0 : index
    %c0_27 = arith.constant 0 : index
    %28 = vector.load %arg4[%c0_26, %c0_27] : memref<128x32xf32, #tpu.memory_space<vmem>>, vector<128x32xf32>
    %cst_28 = arith.constant dense<0.000000e+00> : vector<128x1xf32>
    %29 = tpu.matmul %28, %27, %cst_28 {dimension_numbers = #tpu.dot_dimension_numbers<[1], [0], [0], [1], [0, 0, 1, 1], [], []>, precision = #tpu.contract_precision<fp32>} : vector<128x32xf32>, vector<32x1xf32>, vector<128x1xf32> -> vector<128x1xf32>
    %30 = tpu.iota {dimensions = array<i32: 0>} : vector<128x128xi32>
    %31 = tpu.iota {dimensions = array<i32: 1>} : vector<128x128xi32>
    %32 = arith.cmpi eq, %30, %31 : vector<128x128xi32>
    %33 = vector.shape_cast %29 : vector<128x1xf32> to vector<128x1xf32>
    %34 = vector.broadcast %33 : vector<128x1xf32> to vector<128x128xf32>
    %cst_29 = arith.constant 0.000000e+00 : f32
    %35 = vector.broadcast %cst_29 : f32 to vector<128x128xf32>
    %36 = arith.select %32, %34, %35 : vector<128x128xi1>, vector<128x128xf32>
    %cst_30 = arith.constant dense<0.000000e+00> : vector<128xf32>
    %37 = vector.multi_reduction <add>, %36, %cst_30 [0] : vector<128x128xf32> to vector<128xf32>
    %38 = vector.shape_cast %37 : vector<128xf32> to vector<1x128xf32>
    %c0_31 = arith.constant 0 : index
    %c0_32 = arith.constant 0 : index
    %39 = vector.load %arg5[%c0_31, %c0_32] : memref<3x128xf32, #tpu.memory_space<vmem>>, vector<1x128xf32>
    %40 = arith.addf %38, %39 : vector<1x128xf32>
    %cst_33 = arith.constant 0.000000e+00 : f32
    %41 = vector.broadcast %cst_33 : f32 to vector<1x128xf32>
    %42 = arith.subf %41, %40 : vector<1x128xf32>
    %43 = math.exp %42 : vector<1x128xf32>
    %cst_34 = arith.constant 1.000000e+00 : f32
    %44 = vector.broadcast %cst_34 : f32 to vector<1x128xf32>
    %45 = arith.addf %44, %43 : vector<1x128xf32>
    %46 = tpu.reciprocal %45 : vector<1x128xf32> -> vector<1x128xf32>
    %47 = tpu.iota {dimensions = array<i32: 1>} : vector<1x128xi32>
    %c0_35 = arith.constant 0 : index
    %c0_36 = arith.constant 0 : index
    %c0_37 = arith.constant 0 : index
    %48 = vector.load %arg6[%c0_35, %c0_36, %c0_37] : memref<1x1x128xf32, #tpu.memory_space<vmem>>, vector<1x1x128xf32>
    %49 = vector.shape_cast %48 : vector<1x1x128xf32> to vector<1x128xf32>
    %50 = arith.subf %49, %46 : vector<1x128xf32>
    %51 = arith.mulf %50, %50 : vector<1x128xf32>
    %cst_38 = arith.constant 0.000000e+00 : f32
    %52 = vector.broadcast %cst_38 : f32 to vector<1x128xf32>
    %53 = arith.subf %52, %51 : vector<1x128xf32>
    %c1_39 = arith.constant 1 : index
    %c0_40 = arith.constant 0 : index
    %54 = vector.load %arg5[%c1_39, %c0_40] : memref<3x128xf32, #tpu.memory_space<vmem>>, vector<1x128xf32>
    %55 = arith.mulf %53, %54 : vector<1x128xf32>
    %c2_41 = arith.constant 2 : index
    %c0_42 = arith.constant 0 : index
    %56 = vector.load %arg5[%c2_41, %c0_42] : memref<3x128xf32, #tpu.memory_space<vmem>>, vector<1x128xf32>
    %57 = arith.addf %55, %56 : vector<1x128xf32>
    %c4_i32 = arith.constant 4 : i32
    %58 = vector.broadcast %c4_i32 : i32 to vector<1x128xi32>
    %59 = arith.cmpi slt, %47, %58 : vector<1x128xi32>
    %c8_i32 = arith.constant 8 : i32
    %60 = vector.broadcast %c8_i32 : i32 to vector<1x128xi32>
    %61 = arith.cmpi slt, %47, %60 : vector<1x128xi32>
    %c8_i32_43 = arith.constant 8 : i32
    %62 = vector.broadcast %c8_i32_43 : i32 to vector<1x128xi32>
    %63 = arith.cmpi eq, %47, %62 : vector<1x128xi32>
    %cst_44 = arith.constant 0.000000e+00 : f32
    %64 = vector.broadcast %cst_44 : f32 to vector<1x128xf32>
    %65 = arith.select %63, %40, %64 : vector<1x128xi1>, vector<1x128xf32>
    %66 = arith.select %61, %57, %65 : vector<1x128xi1>, vector<1x128xf32>
    %67 = arith.select %59, %49, %66 : vector<1x128xi1>, vector<1x128xf32>
    %c0_45 = arith.constant 0 : index
    %c0_46 = arith.constant 0 : index
    %c0_47 = arith.constant 0 : index
    %68 = vector.load %arg7[%c0_45, %c0_46, %c0_47] : memref<1x1x128xf32, #tpu.memory_space<vmem>>, vector<1x1x128xf32>
    %69 = vector.shape_cast %68 : vector<1x1x128xf32> to vector<1x128xf32>
    %70 = vector.shape_cast %67 : vector<1x128xf32> to vector<1x1x128xf32>
    tpu.vector_store %arg7[%c0_45, %c0_46, %c0_47], %70 {strides = array<i32>} : memref<1x1x128xf32, #tpu.memory_space<vmem>>, vector<1x1x128xf32>,
    return
  }
  func.func @transform_0(%arg0: i32) -> (i32, i32, i32, i32) {
    %c0_i32 = arith.constant 0 : i32
    %c0_i32_0 = arith.constant 0 : i32
    %c0_i32_1 = arith.constant 0 : i32
    %c0_i32_2 = arith.constant 0 : i32
    return %arg0, %c0_i32, %c0_i32_0, %c0_i32_1 : i32, i32, i32, i32
  }
  func.func @transform_1(%arg0: i32) -> (i32, i32, i32) {
    %c0_i32 = arith.constant 0 : i32
    %c0_i32_0 = arith.constant 0 : i32
    %c0_i32_1 = arith.constant 0 : i32
    %c0_i32_2 = arith.constant 0 : i32
    return %c0_i32, %c0_i32_0, %c0_i32_1 : i32, i32, i32
  }
  func.func @transform_2(%arg0: i32) -> (i32, i32) {
    %c0_i32 = arith.constant 0 : i32
    %c0_i32_0 = arith.constant 0 : i32
    %c0_i32_1 = arith.constant 0 : i32
    return %c0_i32, %c0_i32_0 : i32, i32
  }
  func.func @transform_3(%arg0: i32) -> (i32, i32) {
    %c0_i32 = arith.constant 0 : i32
    %c0_i32_0 = arith.constant 0 : i32
    %c0_i32_1 = arith.constant 0 : i32
    return %c0_i32, %c0_i32_0 : i32, i32
  }
  func.func @transform_4(%arg0: i32) -> (i32, i32) {
    %c0_i32 = arith.constant 0 : i32
    %c0_i32_0 = arith.constant 0 : i32
    %c0_i32_1 = arith.constant 0 : i32
    return %c0_i32, %c0_i32_0 : i32, i32
  }
  func.func @transform_5(%arg0: i32) -> (i32, i32, i32) {
    %c0_i32 = arith.constant 0 : i32
    %c0_i32_0 = arith.constant 0 : i32
    %c0_i32_1 = arith.constant 0 : i32
    return %arg0, %c0_i32, %c0_i32_0 : i32, i32, i32
  }
  func.func @transform_6(%arg0: i32) -> (i32, i32, i32) {
    %c0_i32 = arith.constant 0 : i32
    %c0_i32_0 = arith.constant 0 : i32
    %c0_i32_1 = arith.constant 0 : i32
    return %arg0, %c0_i32, %c0_i32_0 : i32, i32, i32
  }
}

</mosaic_0001>

<bundles_post_ra>
// kernel: cam_control_forward.1
= control target key start
LH: loop header
LB: loop body
LE: loop exit
PB: predicated region body
PF: predicated region fallthrough
CT: control target
= control target key end

     0   :  { %s1993_s21 = smov 0   ;;  %s2588_s0 = inlined_call_operand.vmem [shape: f32[2,4,32,64], index: 0, kind: input, shape index: {}]   ;;  %s2589_s1 = inlined_call_operand.vmem [shape: f32[2,32,32], index: 1, kind: input, shape index: {}]   ;;  %s2590_s2 = inlined_call_operand.vmem [shape: f32[32,2], index: 2, kind: input, shape index: {}]   ;;  %s2591_s3 = inlined_call_operand.vmem [shape: f32[128,32], index: 3, kind: input, shape index: {}]   ;;  %s2592_s4 = inlined_call_operand.vmem [shape: f32[3,128], index: 4, kind: input, shape index: {}]   ;;  %s2593_s5 = inlined_call_operand.vmem [shape: f32[2,1,128], index: 5, kind: input, shape index: {}]   ;;  %s2594_s6 = inlined_call_operand.vmem [shape: f32[2,1,128], index: 6, kind: output, shape index: {}]  }
   0x1 LB: > { %s1897_s22 = sadd.s32 4294967295, %s1954_s21   ;;  %p1901_p0 = scmp.ge.s32.totalorder %s1954_s21, 1  ;;  %s1954_s21 = sphi %s1993_s21, %s16_s21  }
   0x2   : > { %p220_p1 = scmp.lt.s32.totalorder %s1954_s21, 3 }
   0x4   : > { %p221_p2 = pnand %p1901_p0, %p220_p1 }
   0x5   : > { %p251_p3 = scmp.lt.s32.totalorder (!%p221_p2), %s1897_s22, 1  ;;  %s1957_s19 = smov (!%p221_p2), 127  }
   0x6   : > { %224 = sbr.rel (%p221_p2) target bundleno = 1072 (0x430), region = 44 }
   0xb   : > { %v293_v0 = vld [vmem:[%s2589_s1] sm:$0xff]  ;;  %vm326_vm0 = vcmask 261120   ;;  %v2007_v1 = vld [vmem:[%s2590_s2 + $0x8] sm:$0xff]  ;;  %v1956_v3 = vmov 0   ;;  %s2596_s22 = smov (!%p251_p3, %s1897_s22), 1  ;;  %v295_v18 = vld [vmem:[%s2589_s1 + $0x10] sm:$0xff] }
   0xc   : > { %v328_v2 = vsel %vm326_vm0, %v293_v0, 0  ;;  %1942 = vset.pattern.permute.xlu1 %v1956_v3  ;;  %1941 = vset.pattern.permute.xlu0 %v1956_v3  ;;  %s1922_s27 = sshll.u32 %s2596_s22, 7  ;;  %v294_v5 = vld [vmem:[%s2589_s1 + $0x8] sm:$0xff]  ;;  %v2052_v33 = vld [vmem:[%s2590_s2] sm:$0xff]  ;;  %v334_v39 = vsel %vm326_vm0, %v295_v18, 0  ;;  %v2068_v44 = vld [vmem:[%s2590_s2 + $0x18] sm:$0xff]  ;;  %s258_s20 = scalar_lea.vmem %s2593_s5, %s2596_s22 }
   0xd   : > { %v2012_v4 = vand.u32 4294901760, %v328_v2  ;;  %313 = vperm.xlu1 %1942, %v2007_v1   ;;  %1943 = vset.pattern.permute.xlu2 %v1956_v3  ;;  %s2022_s8 = scalar_lea.vmem %s2588_s0, %s1922_s27  ;;  %v331_v13 = vsel %vm326_vm0, %v294_v5, 0  ;;  %v2076_v51 = vand.u32 4294901760, %v334_v39  ;;  %v296_v60 = vld [vmem:[%s2589_s1 + $0x18] sm:$0xff]  ;;  %vm621_vm1 = vcmask 523264   ;;  %s261_s29 = scalar_lea.vmem %s2594_s6, %s2596_s22 }
   0xe   : > { %v265_v6 = vld [vmem:[%s2022_s8 + $0x18] sm:$0xff]  ;;  %v264_v11 = vld [vmem:[%s2022_s8 + $0x10] sm:$0xff]  ;;  %v263_v17 = vld [vmem:[%s2022_s8 + $0x8] sm:$0xff]  ;;  %v2046_v29 = vand.u32 4294901760, %v331_v13  ;;  %323 = vperm.xlu0 %1941, %v2068_v44  }
   0xf   : > { %v1907_v7 = vld [vmem:[%s2022_s8 + $0x38] sm:$0xff]  ;;  %v2028_v9 = vsub.f32 %v328_v2, %v2012_v4  ;;  %v1906_v12 = vld [vmem:[%s2022_s8 + $0x30] sm:$0xff]  ;;  %v1905_v21 = vld [vmem:[%s2022_s8 + $0x28] sm:$0xff]  ;;  %v376_v3 = vsub.f32 %v334_v39, %v2076_v51 }
  0x10   : > { %v1911_v8 = vld [vmem:[%s2022_s8 + $0x58] sm:$0xff]  ;;  %v274_v10 = vmax.f32 %v265_v6, %v1907_v7  ;;  %v273_v15 = vmax.f32 %v264_v11, %v1906_v12  ;;  %v1910_v16 = vld [vmem:[%s2022_s8 + $0x50] sm:$0xff]  ;;  %v1909_v22 = vld [vmem:[%s2022_s8 + $0x48] sm:$0xff]  ;;  %v272_v24 = vmax.f32 %v263_v17, %v1905_v21  ;;  %v2063_v43 = vsub.f32 %v331_v13, %v2046_v29 }
  0x11   : > { %v1915_v14 = vld [vmem:[%s2022_s8 + $0x78] sm:$0xff]  ;;  %v1914_v20 = vld [vmem:[%s2022_s8 + $0x70] sm:$0xff]  ;;  %v262_v25 = vld [vmem:[%s2022_s8] sm:$0xff]  ;;  %v361_v28 = vand.u32 4294901760, %v2028_v9  ;;  %v337_v6 = vsel %vm326_vm0, %v296_v60, 0  ;;  %v377_v12 = vand.u32 4294901760, %v376_v3 }
  0x12   : > { %v283_v19 = vmax.f32 %v274_v10, %v1911_v8  ;;  %v282_v23 = vmax.f32 %v273_v15, %v1910_v16  ;;  %v1904_v26 = vld [vmem:[%s2022_s8 + $0x20] sm:$0xff]  ;;  %v1913_v31 = vld [vmem:[%s2022_s8 + $0x68] sm:$0xff]  ;;  %v281_v35 = vmax.f32 %v272_v24, %v1909_v22  ;;  %v369_v55 = vand.u32 4294901760, %v2063_v43  ;;  %v2089_v7 = vld [vmem:[%s2590_s2 + $0x10] sm:$0xff] }
  0x13   : > { %v1908_v27 = vld [vmem:[%s2022_s8 + $0x40] sm:$0xff]  ;;  %v271_v32 = vmax.f32 %v262_v25, %v1904_v26  ;;  %v362_v42 = vsub.f32 %v2028_v9, %v361_v28  ;;  %v383_v13 = vand.u32 4294901760, %v337_v6 }
  0x14   : > { %v292_v30 = vmax.f32 %v283_v19, %v1915_v14  ;;  %v291_v34 = vmax.f32 %v282_v23, %v1914_v20  ;;  %v1912_v36 = vld [vmem:[%s2022_s8 + $0x60] sm:$0xff]  ;;  %v290_v41 = vmax.f32 %v281_v35, %v1913_v31  ;;  %v370_v2 = vsub.f32 %v2063_v43, %v369_v55 }
  0x15   : > { %308 = vperm.xlu1 %1942, %v2052_v33   ;;  %v280_v38 = vmax.f32 %v271_v32, %v1908_v27  ;;  %v363_v52 = vand.u32 4294901760, %v362_v42  ;;  %v378_v14 = vsub.f32 %v376_v3, %v377_v12  ;;  %v384_v15 = vsub.f32 %v337_v6, %v383_v13 }
  0x16   : > { %v2056_v37 = vand.u32 4294901760, %v292_v30  ;;  %v2059_v40 = vand.u32 4294901760, %v291_v34  ;;  %v355_v47 = vand.u32 4294901760, %v290_v41  ;;  %v371_v11 = vand.u32 4294901760, %v370_v2  ;;  %318 = vperm.xlu0 %1941, %v2089_v7  }
  0x17   : > { %v289_v46 = vmax.f32 %v280_v38, %v1912_v36  ;;  %v385_v16 = vand.u32 4294901760, %v384_v15 }
  0x18   : > { %352 = vmatpush.msra.mxu0 %v2056_v37  ;;  %v405_v45 = vsub.f32 %v292_v30, %v2056_v37  ;;  %503 = vmatpush.msra.mxu3 %v2056_v37  ;;  %v411_v48 = vsub.f32 %v291_v34, %v2059_v40  ;;  %v417_v53 = vsub.f32 %v290_v41, %v355_v47 }
  0x19   : > { %v357_v49 = vand.u32 4294901760, %v289_v46  ;;  %v386_v17 = vsub.f32 %v384_v15, %v385_v16 }
  0x1a   : > { %354 = vmatpush.msra.mxu0 %v2059_v40  ;;  %459 = vmatpush.msra.mxu2 %v405_v45  ;;  %v406_v50 = vand.u32 4294901760, %v405_v45  ;;  %v412_v54 = vand.u32 4294901760, %v411_v48  ;;  %v418_v59 = vand.u32 4294901760, %v417_v53 }
  0x1b   : > { %505 = vmatpush.msra.mxu3 %v2059_v40  ;;  %v423_v57 = vsub.f32 %v289_v46, %v357_v49  ;;  %v387_v18 = vand.u32 4294901760, %v386_v17 }
  0x1c   : > { %356 = vmatpush.msra.mxu0 %v355_v47  ;;  %462 = vmatpush.msra.mxu2 %v411_v48  ;;  %v407_v56 = vsub.f32 %v405_v45, %v406_v50  ;;  %v413_v58 = vsub.f32 %v411_v48, %v412_v54  ;;  %v419_v0 = vsub.f32 %v417_v53, %v418_v59 }
  0x1d   : > { %507 = vmatpush.msra.mxu3 %v355_v47  ;;  %v424_v62 = vand.u32 4294901760, %v423_v57 }
  0x1e   : > { %358 = vmatpush.msra.mxu0 %v357_v49  ;;  %v408_v61 = vand.u32 4294901760, %v407_v56  ;;  %465 = vmatpush.msra.mxu2 %v417_v53  ;;  %v414_v63 = vand.u32 4294901760, %v413_v58  ;;  %v420_v8 = vand.u32 4294901760, %v419_v0 }
  0x1f   : > { %364 = vmatmul.f32.vlgmr.msra.gmra.mxu0 %v363_v52  ;;  %509 = vmatpush.msra.mxu3 %v357_v49  ;;  %v425_v5 = vsub.f32 %v423_v57, %v424_v62 }
  0x20   : > { %409 = vmatpush.msra.mxu1 %v408_v61  ;;  %468 = vmatpush.msra.mxu2 %v423_v57 }
  0x21   : > { %471 = vmatmul.f32.vlgmr.msra.gmra.mxu2 %v2028_v9  ;;  %513 = vmatmul.f32.vlgmr.msra.gmra.mxu3 %v361_v28  ;;  %v426_v10 = vand.u32 4294901760, %v425_v5  ;;  %v379_v9 = vand.u32 4294901760, %v378_v14 }
  0x22   : > { %415 = vmatpush.msra.mxu1 %v414_v63  ;;  %550 = vmatpush.msrb.mxu0 %v406_v50 }
  0x24   : > { %421 = vmatpush.msra.mxu1 %v420_v8  ;;  %554 = vmatpush.msrb.mxu0 %v412_v54 }
  0x26   : > { %427 = vmatpush.msra.mxu1 %v426_v10  ;;  %558 = vmatpush.msrb.mxu0 %v418_v59 }
  0x27   : > { %372 = vmatmul.f32.gmra.mxu0 %v371_v11  ;;  %429 = vmatmul.f32.vlgmr.msra.gmra.mxu1 %v2012_v4 }
  0x28   : > { %562 = vmatpush.msrb.mxu0 %v424_v62  ;;  %593 = vmatpush.msrb.mxu1 %v2056_v37 }
  0x29   : > { %476 = vmatmul.f32.gmra.mxu2 %v2063_v43  ;;  %519 = vmatmul.f32.gmra.mxu3 %v369_v55 }
  0x2a   : > { %595 = vmatpush.msrb.mxu1 %v2059_v40 }
  0x2c   : > { %597 = vmatpush.msrb.mxu1 %v355_v47 }
  0x2e   : > { %599 = vmatpush.msrb.mxu1 %v357_v49 }
  0x2f   : > { %380 = vmatmul.f32.gmra.mxu0 %v379_v9  ;;  %433 = vmatmul.f32.gmra.mxu1 %v2046_v29 }
  0x31   : > { %481 = vmatmul.f32.gmra.mxu2 %v376_v3  ;;  %525 = vmatmul.f32.gmra.mxu3 %v377_v12 }
  0x37   : > { %388 = vmatmul.f32.gmra.mxu0 %v387_v18  ;;  %437 = vmatmul.f32.gmra.mxu1 %v2076_v51 }
  0x39   : > { %486 = vmatmul.f32.gmra.mxu2 %v384_v15  ;;  %531 = vmatmul.f32.gmra.mxu3 %v385_v16 }
  0x3f   : > { %441 = vmatmul.f32.gmra.mxu1 %v383_v13  ;;  %564 = vmatmul.f32.vlgmr.msrb.gmra.mxu0 %v2012_v4 }
  0x47   : > { %568 = vmatmul.f32.gmra.mxu0 %v2046_v29  ;;  %601 = vmatmul.f32.vlgmr.msrb.gmra.mxu1 %v2012_v4 }
  0x4f   : > { %572 = vmatmul.f32.gmra.mxu0 %v2076_v51  ;;  %605 = vmatmul.f32.gmra.mxu1 %v2046_v29 }
  0x57   : > { %576 = vmatmul.f32.gmra.mxu0 %v383_v13  ;;  %609 = vmatmul.f32.gmra.mxu1 %v2076_v51 }
  0x5f   : > { %613 = vmatmul.f32.gmra.mxu1 %v383_v13 }
  0x7f   : > { %v314_v22 = vpop.permute.xlu1 %313 }
  0x80   : > { %v324_v40 = vpop.permute.xlu0 %323 }
  0x87   : > { %v309_v25 = vpop.permute.xlu1 %308 }
  0x88   : > { %v319_v56 = vpop.permute.xlu0 %318 }
  0x9c   : > { %v365_v19 = vpop.f32.mrf.mxu0 }
  0x9d   : > { %v366_v30 = vadd.f32 %v365_v19, %v309_v25  ;;  %v1916_v19 = vld [vmem:[%s2589_s1 + $0x20] sm:$0xff] }
  0xa4   : > { %v373_v20 = vpop.f32.mrf.mxu0  ;;  %v430_v21 = vpop.f32.mrf.mxu1 }
  0xa5   : > { %v472_v26 = vpop.f32.mrf.mxu2  ;;  %v514_v4 = vpop.f32.mrf.mxu3  ;;  %v431_v31 = vadd.f32 %v430_v21, %v366_v30  ;;  %v374_v29 = vadd.f32 %v373_v20, %v314_v22  ;;  %v647_v20 = vsel %vm326_vm0, %v1916_v19, 0  ;;  %v1917_v22 = vld [vmem:[%s2589_s1 + $0x28] sm:$0xff] }
  0xa6   : > { %v2117_v21 = vand.u32 4294901760, %v647_v20 }
  0xa7   : > { %v473_v35 = vadd.f32 %v472_v26, %v431_v31  ;;  %v1918_v31 = vld [vmem:[%s2589_s1 + $0x30] sm:$0xff] }
  0xa9   : > { %v515_v37 = vadd.f32 %v514_v4, %v473_v35 }
  0xac   : > { %v381_v23 = vpop.f32.mrf.mxu0  ;;  %v434_v24 = vpop.f32.mrf.mxu1 }
  0xad   : > { %v477_v36 = vpop.f32.mrf.mxu2  ;;  %v435_v38 = vadd.f32 %v434_v24, %v374_v29  ;;  %v520_v39 = vpop.f32.mrf.mxu3  ;;  %v382_v59 = vadd.f32 %v381_v23, %v319_v56 }
  0xaf   : > { %v478_v45 = vadd.f32 %v477_v36, %v435_v38 }
  0xb1   : > { %v521_v49 = vadd.f32 %v520_v39, %v478_v45 }
  0xb4   : > { %v389_v27 = vpop.f32.mrf.mxu0  ;;  %v438_v28 = vpop.f32.mrf.mxu1 }
  0xb5   : > { %v482_v48 = vpop.f32.mrf.mxu2  ;;  %v526_v52 = vpop.f32.mrf.mxu3  ;;  %v390_v54 = vadd.f32 %v389_v27, %v324_v40  ;;  %v439_v0 = vadd.f32 %v438_v28, %v382_v59  ;;  %v653_v40 = vsel %vm326_vm0, %v1918_v31, 0 }
  0xb7   : > { %v483_v6 = vadd.f32 %v482_v48, %v439_v0 }
  0xb9   : > { %v527_v12 = vadd.f32 %v526_v52, %v483_v6 }
  0xbc   : > { %v442_v32 = vpop.f32.mrf.mxu1  ;;  %v565_v34 = vpop.f32.mrf.mxu0 }
  0xbd   : > { %v566_v41 = vadd.f32 %v565_v34, %v515_v37  ;;  %v443_v60 = vadd.f32 %v442_v32, %v390_v54  ;;  %v487_v62 = vpop.f32.mrf.mxu2  ;;  %v532_v3 = vpop.f32.mrf.mxu3 }
  0xbf   : > { %v488_v2 = vadd.f32 %v487_v62, %v443_v60 }
  0xc1   : > { %v533_v8 = vadd.f32 %v532_v3, %v488_v2 }
  0xc4   : > { %v569_v42 = vpop.f32.mrf.mxu0  ;;  %v602_v43 = vpop.f32.mrf.mxu1 }
  0xc5   : > { %v603_v46 = vadd.f32 %v602_v43, %v566_v41  ;;  %v570_v51 = vadd.f32 %v569_v42, %v521_v49  ;;  %v1919_v49 = vld [vmem:[%s2589_s1 + $0x38] sm:$0xff] }
  0xc6   : > { %v656_v56 = vsel %vm326_vm0, %v1919_v49, 0 }
  0xc7   : > { %v617_v47 = vmax.f32 %v603_v46, 0.0  ;;  %v694_v46 = vand.u32 4294901760, %v653_v40  ;;  %v702_v60 = vand.u32 4294901760, %v656_v56 }
  0xc9   : > { %v622_v50 = vsel %vm621_vm1, %v617_v47, -inf }
  0xca   : > { %623 = vmax.xlane.f32.xlu1 %v622_v50 }
  0xcc   : > { %v606_v53 = vpop.f32.mrf.mxu1  ;;  %v573_v57 = vpop.f32.mrf.mxu0 }
  0xcd   : > { %v607_v55 = vadd.f32 %v606_v53, %v570_v51  ;;  %v574_v14 = vadd.f32 %v573_v57, %v527_v12  ;;  %v695_v53 = vsub.f32 %v653_v40, %v694_v46 }
  0xcf   : > { %v618_v58 = vmax.f32 %v607_v55, 0.0  ;;  %v696_v59 = vand.u32 4294901760, %v695_v53 }
  0xd1   : > { %v625_v61 = vsel %vm621_vm1, %v618_v58, -inf  ;;  %v697_v62 = vsub.f32 %v695_v53, %v696_v59 }
  0xd2   : > { %626 = vmax.xlane.f32.xlu0 %v625_v61 }
  0xd3   : > { %v698_v0 = vand.u32 4294901760, %v697_v62 }
  0xd4   : > { %v610_v63 = vpop.f32.mrf.mxu1  ;;  %v577_v5 = vpop.f32.mrf.mxu0 }
  0xd5   : > { %v578_v10 = vadd.f32 %v577_v5, %v533_v8  ;;  %v611_v9 = vadd.f32 %v610_v63, %v574_v14  ;;  %v703_v63 = vsub.f32 %v656_v56, %v702_v60  ;;  %v949_v56 = vld [vmem:[%s2591_s3 + $0x48] sm:$0xff] }
  0xd7   : > { %v619_v17 = vmax.f32 %v611_v9, 0.0  ;;  %v704_v2 = vand.u32 4294901760, %v703_v63 }
  0xd9   : > { %v628_v18 = vsel %vm621_vm1, %v619_v17, -inf  ;;  %v705_v3 = vsub.f32 %v703_v63, %v704_v2 }
  0xdb   : > { %v706_v5 = vand.u32 4294901760, %v705_v3 }
  0xdc   : > { %v614_v11 = vpop.f32.mrf.mxu1 }
  0xdd   : > { %v615_v13 = vadd.f32 %v614_v11, %v578_v10 }
  0xdf   : > { %v620_v15 = vmax.f32 %v615_v13, 0.0 }
  0xe1   : > { %v631_v16 = vsel %vm621_vm1, %v620_v15, -inf }
  0xe2   : > { %632 = vmax.xlane.f32.xlu2 %v631_v16 }
  0xea   : > { %629 = vmax.xlane.f32.xlu2 %v628_v18 }
 0x102   : > { %640 = vrot.lane.b32.xlu2 %v2068_v44, %s1957_s19 }
 0x10a   : > { %638 = vrot.lane.b32.xlu2 %v2089_v7, %s1957_s19  ;;  %v679_v7 = vsub.f32 %v647_v20, %v2117_v21 }
 0x10c   : > { %v680_v27 = vand.u32 4294901760, %v679_v7 }
 0x10e   : > { %v681_v35 = vsub.f32 %v679_v7, %v680_v27 }
 0x110   : > { %v682_v43 = vand.u32 4294901760, %v681_v35 }
 0x112   : > { %636 = vrot.lane.b32.xlu2 %v2007_v1, %s1957_s19  ;;  %v650_v1 = vsel %vm326_vm0, %v1917_v22, 0 }
 0x113   : > { %v2131_v28 = vand.u32 4294901760, %v650_v1 }
 0x115   : > { %v687_v36 = vsub.f32 %v650_v1, %v2131_v28 }
 0x117   : > { %v688_v45 = vand.u32 4294901760, %v687_v36 }
 0x119   : > { %v689_v52 = vsub.f32 %v687_v36, %v688_v45 }
 0x11a   : > { %634 = vrot.lane.b32.xlu2 %v2052_v33, %s1957_s19 }
 0x11b   : > { %v690_v58 = vand.u32 4294901760, %v689_v52 }
 0x13d   : > { %v624_v33 = vpop.xlane.xlu1 %623 }
 0x13e   : > { %v2133_v30 = vand.u32 4294901760, %v624_v33 }
 0x140   : > { %v742_v37 = vsub.f32 %v624_v33, %v2133_v30 }
 0x142   : > { %v743_v48 = vand.u32 4294901760, %v742_v37 }
 0x144   : > { %v744_v55 = vsub.f32 %v742_v37, %v743_v48 }
 0x145   : > { %v627_v23 = vpop.xlane.xlu0 %626 }
 0x146   : > { %v2126_v25 = vand.u32 4294901760, %v627_v23  ;;  %v745_v61 = vand.u32 4294901760, %v744_v55 }
 0x148   : > { %v736_v32 = vsub.f32 %v627_v23, %v2126_v25 }
 0x14a   : > { %v737_v42 = vand.u32 4294901760, %v736_v32 }
 0x14c   : > { %v738_v51 = vsub.f32 %v736_v32, %v737_v42 }
 0x14e   : > { %v739_v57 = vand.u32 4294901760, %v738_v51 }
 0x155   : > { %v633_v44 = vpop.xlane.xlu2 %632 }
 0x156   : > { %v2123_v24 = vand.u32 4294901760, %v633_v44 }
 0x158   : > { %v724_v26 = vsub.f32 %v633_v44, %v2123_v24  ;;  %671 = vmatpush.msrb.mxu2 %v2123_v24  ;;  %822 = vmatpush.msra.mxu1 %v2123_v24 }
 0x15a   : > { %778 = vmatpush.msra.mxu0 %v724_v26  ;;  %v725_v4 = vand.u32 4294901760, %v724_v26 }
 0x15c   : > { %v726_v34 = vsub.f32 %v724_v26, %v725_v4 }
 0x15d   : > { %v630_v29 = vpop.xlane.xlu2 %629 }
 0x15e   : > { %v672_v38 = vand.u32 4294901760, %v630_v29  ;;  %v727_v39 = vand.u32 4294901760, %v726_v34 }
 0x160   : > { %v730_v41 = vsub.f32 %v630_v29, %v672_v38  ;;  %673 = vmatpush.msrb.mxu2 %v672_v38  ;;  %728 = vmatpush.msrb.mxu3 %v727_v39 }
 0x161   : > { %824 = vmatpush.msra.mxu1 %v672_v38 }
 0x162   : > { %675 = vmatpush.msrb.mxu2 %v2126_v25  ;;  %781 = vmatpush.msra.mxu0 %v730_v41  ;;  %v731_v47 = vand.u32 4294901760, %v730_v41 }
 0x163   : > { %826 = vmatpush.msra.mxu1 %v2126_v25 }
 0x164   : > { %677 = vmatpush.msrb.mxu2 %v2133_v30  ;;  %784 = vmatpush.msra.mxu0 %v736_v32  ;;  %v732_v50 = vsub.f32 %v730_v41, %v731_v47 }
 0x165   : > { %828 = vmatpush.msra.mxu1 %v2133_v30  ;;  %683 = vmatmul.f32.vlgmr.msrb.gmra.mxu2 %v682_v43  ;;  %v641_v11 = vpop.permute.xlu2 %640 }
 0x166   : > { %869 = vmatpush.msra.mxu2 %v725_v4  ;;  %787 = vmatpush.msra.mxu0 %v742_v37  ;;  %v733_v54 = vand.u32 4294901760, %v732_v50 }
 0x167   : > { %790 = vmatmul.f32.vlgmr.msra.gmra.mxu0 %v679_v7  ;;  %832 = vmatmul.f32.vlgmr.msra.gmra.mxu1 %v680_v27 }
 0x168   : > { %873 = vmatpush.msra.mxu2 %v731_v47  ;;  %734 = vmatpush.msrb.mxu3 %v733_v54 }
 0x16a   : > { %877 = vmatpush.msra.mxu2 %v737_v42  ;;  %740 = vmatpush.msrb.mxu3 %v739_v57 }
 0x16c   : > { %881 = vmatpush.msra.mxu2 %v743_v48  ;;  %746 = vmatpush.msrb.mxu3 %v745_v61 }
 0x16d   : > { %691 = vmatmul.f32.gmra.mxu2 %v690_v58  ;;  %748 = vmatmul.f32.vlgmr.msrb.gmra.mxu3 %v2117_v21  ;;  %v639_v14 = vpop.permute.xlu2 %638 }
 0x16e   : > { %912 = vmatpush.msra.mxu3 %v2123_v24 }
 0x16f   : > { %795 = vmatmul.f32.gmra.mxu0 %v687_v36  ;;  %838 = vmatmul.f32.gmra.mxu1 %v688_v45  ;;  %v948_v36 = vld [vmem:[%s2591_s3 + $0x40] sm:$0xff] }
 0x170   : > { %914 = vmatpush.msra.mxu3 %v672_v38  ;;  %v981_v45 = vsel %vm326_vm0, %v948_v36, 0 }
 0x171   : > { %v2163_v52 = vand.u32 4294901760, %v981_v45 }
 0x172   : > { %916 = vmatpush.msra.mxu3 %v2126_v25 }
 0x174   : > { %918 = vmatpush.msra.mxu3 %v2133_v30 }
 0x175   : > { %699 = vmatmul.f32.gmra.mxu2 %v698_v0  ;;  %752 = vmatmul.f32.gmra.mxu3 %v2131_v28  ;;  %v637_v18 = vpop.permute.xlu2 %636  ;;  %v984_v0 = vsel %vm326_vm0, %v949_v56, 0 }
 0x177   : > { %800 = vmatmul.f32.gmra.mxu0 %v695_v53  ;;  %844 = vmatmul.f32.gmra.mxu1 %v696_v59  ;;  %v2169_v59 = vsub.f32 %v981_v45, %v2163_v52 }
 0x17d   : > { %707 = vmatmul.f32.gmra.mxu2 %v706_v5  ;;  %756 = vmatmul.f32.gmra.mxu3 %v694_v46  ;;  %v635_v23 = vpop.permute.xlu2 %634 }
 0x17f   : > { %805 = vmatmul.f32.gmra.mxu0 %v703_v63  ;;  %850 = vmatmul.f32.gmra.mxu1 %v704_v2 }
 0x185   : > { %760 = vmatmul.f32.gmra.mxu3 %v702_v60  ;;  %883 = vmatmul.f32.vlgmr.msra.gmra.mxu2 %v2117_v21 }
 0x18d   : > { %887 = vmatmul.f32.gmra.mxu2 %v2131_v28  ;;  %920 = vmatmul.f32.vlgmr.msra.gmra.mxu3 %v2117_v21 }
 0x195   : > { %891 = vmatmul.f32.gmra.mxu2 %v694_v46  ;;  %924 = vmatmul.f32.gmra.mxu3 %v2131_v28 }
 0x19d   : > { %895 = vmatmul.f32.gmra.mxu2 %v702_v60  ;;  %928 = vmatmul.f32.gmra.mxu3 %v694_v46 }
 0x1a5   : > { %932 = vmatmul.f32.gmra.mxu3 %v702_v60  ;;  %v940_v60 = vld [vmem:[%s2591_s3] sm:$0xff] }
 0x1e4   : > { %v791_v15 = vpop.f32.mrf.mxu0  ;;  %v833_v17 = vpop.f32.mrf.mxu1 }
 0x1e8   : > { %v684_v6 = vpop.f32.mrf.mxu2 }
 0x1e9   : > { %v685_v33 = vadd.f32 %v684_v6, %v635_v23  ;;  %v957_v6 = vsel %vm326_vm0, %v940_v60, 0 }
 0x1ec   : > { %v796_v21 = vpop.f32.mrf.mxu0  ;;  %v839_v22 = vpop.f32.mrf.mxu1 }
 0x1f0   : > { %v692_v8 = vpop.f32.mrf.mxu2  ;;  %v749_v10 = vpop.f32.mrf.mxu3 }
 0x1f1   : > { %v693_v24 = vadd.f32 %v692_v8, %v637_v18  ;;  %v750_v28 = vadd.f32 %v749_v10, %v685_v33  ;;  %v1090_v8 = vand.u32 4294901760, %v2169_v59  ;;  %v2181_v10 = vand.u32 4294901760, %v984_v0 }
 0x1f3   : > { %v792_v35 = vadd.f32 %v791_v15, %v750_v28  ;;  %v950_v15 = vld [vmem:[%s2591_s3 + $0x50] sm:$0xff]  ;;  %v2198_v18 = vsub.f32 %v984_v0, %v2181_v10 }
 0x1f4   : > { %v801_v25 = vpop.f32.mrf.mxu0  ;;  %v845_v30 = vpop.f32.mrf.mxu1  ;;  %v987_v23 = vsel %vm326_vm0, %v950_v15, 0 }
 0x1f5   : > { %v834_v41 = vadd.f32 %v833_v17, %v792_v35  ;;  %v1091_v17 = vsub.f32 %v2169_v59, %v1090_v8 }
 0x1f7   : > { %v1092_v33 = vand.u32 4294901760, %v1091_v17 }
 0x1f8   : > { %v700_v12 = vpop.f32.mrf.mxu2  ;;  %v753_v13 = vpop.f32.mrf.mxu3 }
 0x1f9   : > { %v701_v1 = vadd.f32 %v700_v12, %v639_v14  ;;  %v754_v26 = vadd.f32 %v753_v13, %v693_v24  ;;  %v2186_v14 = vand.u32 4294901760, %v957_v6 }
 0x1fb   : > { %v797_v31 = vadd.f32 %v796_v21, %v754_v26  ;;  %v2215_v26 = vand.u32 4294901760, %v987_v23 }
 0x1fc   : > { %v806_v40 = vpop.f32.mrf.mxu0  ;;  %v851_v51 = vpop.f32.mrf.mxu1 }
 0x1fd   : > { %v840_v37 = vadd.f32 %v839_v22, %v797_v31  ;;  %v2231_v36 = vsub.f32 %v987_v23, %v2215_v26 }
 0x200   : > { %v708_v9 = vpop.f32.mrf.mxu2  ;;  %v757_v16 = vpop.f32.mrf.mxu3 }
 0x201   : > { %v758_v27 = vadd.f32 %v757_v16, %v701_v1  ;;  %v709_v32 = vadd.f32 %v708_v9, %v641_v11 }
 0x203   : > { %v802_v34 = vadd.f32 %v801_v25, %v758_v27  ;;  %v1098_v25 = vand.u32 4294901760, %v2198_v18 }
 0x205   : > { %v846_v38 = vadd.f32 %v845_v30, %v802_v34  ;;  %v1099_v35 = vsub.f32 %v2198_v18, %v1098_v25 }
 0x208   : > { %v761_v19 = vpop.f32.mrf.mxu3  ;;  %v884_v20 = vpop.f32.mrf.mxu2 }
 0x209   : > { %v762_v39 = vadd.f32 %v761_v19, %v709_v32  ;;  %v885_v47 = vadd.f32 %v884_v20, %v834_v41  ;;  %v941_v19 = vld [vmem:[%s2591_s3 + $0x8] sm:$0xff]  ;;  %v951_v32 = vld [vmem:[%s2591_s3 + $0x58] sm:$0xff] }
 0x20a   : > { %v960_v1 = vsel %vm326_vm0, %v941_v19, 0 }
 0x20b   : > { %v807_v48 = vadd.f32 %v806_v40, %v762_v39  ;;  %v2220_v31 = vand.u32 4294901760, %v960_v1  ;;  %v990_v40 = vsel %vm326_vm0, %v951_v32, 0 }
 0x20d   : > { %v852_v57 = vadd.f32 %v851_v51, %v807_v48  ;;  %v2245_v48 = vand.u32 4294901760, %v990_v40 }
 0x20f   : > { %v2257_v56 = vsub.f32 %v990_v40, %v2245_v48 }
 0x210   : > { %v888_v44 = vpop.f32.mrf.mxu2  ;;  %v921_v7 = vpop.f32.mrf.mxu3 }
 0x211   : > { %v889_v42 = vadd.f32 %v888_v44, %v840_v37  ;;  %v922_v53 = vadd.f32 %v921_v7, %v885_v47  ;;  %v2209_v44 = vsub.f32 %v957_v6, %v2186_v14  ;;  %v942_v37 = vld [vmem:[%s2591_s3 + $0x10] sm:$0xff]  ;;  %v1106_v47 = vand.u32 4294901760, %v2231_v36 }
 0x212   : > { %v963_v45 = vsel %vm326_vm0, %v942_v37, 0 }
 0x213   : > { %v936_v61 = vmax.f32 %v922_v53, 0.0  ;;  %v2248_v53 = vand.u32 4294901760, %v963_v45 }
 0x215   : > { %v2183_v11 = vand.u32 4294901760, %v936_v61 }
 0x217   : > { %v1184_v22 = vsub.f32 %v936_v61, %v2183_v11  ;;  %v2270_v61 = vsub.f32 %v963_v45, %v2248_v53 }
 0x218   : > { %v925_v4 = vpop.f32.mrf.mxu3  ;;  %v892_v29 = vpop.f32.mrf.mxu2 }
 0x219   : > { %v893_v43 = vadd.f32 %v892_v29, %v846_v38  ;;  %v926_v49 = vadd.f32 %v925_v4, %v889_v42  ;;  %v1185_v30 = vand.u32 4294901760, %v1184_v22  ;;  %v1026_v4 = vand.u32 4294901760, %v2209_v44 }
 0x21a   : > { %v2241_v42 = vsub.f32 %v960_v1, %v2220_v31  ;;  %v954_v1 = vld [vmem:[%s2591_s3 + $0x70] sm:$0xff] }
 0x21b   : > { %v937_v58 = vmax.f32 %v926_v49, 0.0  ;;  %v1186_v39 = vsub.f32 %v1184_v22, %v1185_v30  ;;  %v1027_v41 = vsub.f32 %v2209_v44, %v1026_v4 }
 0x21c   : > { %v1034_v51 = vand.u32 4294901760, %v2241_v42 }
 0x21d   : > { %v2177_v3 = vand.u32 4294901760, %v937_v58  ;;  %v1187_v49 = vand.u32 4294901760, %v1186_v39 }
 0x21e   : > { %v1035_v60 = vsub.f32 %v2241_v42, %v1034_v51 }
 0x21f   : > { %v1178_v16 = vsub.f32 %v937_v58, %v2177_v3 }
 0x220   : > { %v929_v46 = vpop.f32.mrf.mxu3  ;;  %v896_v55 = vpop.f32.mrf.mxu2  ;;  %v1036_v6 = vand.u32 4294901760, %v1035_v60 }
 0x221   : > { %v930_v50 = vadd.f32 %v929_v46, %v893_v43  ;;  %v897_v62 = vadd.f32 %v896_v55, %v852_v57  ;;  %v1179_v24 = vand.u32 4294901760, %v1178_v16  ;;  %v1100_v46 = vand.u32 4294901760, %v1099_v35  ;;  %v943_v57 = vld [vmem:[%s2591_s3 + $0x18] sm:$0xff] }
 0x222   : > { %v1107_v55 = vsub.f32 %v2231_v36, %v1106_v47 }
 0x223   : > { %v938_v54 = vmax.f32 %v930_v50, 0.0  ;;  %v1180_v29 = vsub.f32 %v1178_v16, %v1179_v24  ;;  %v1028_v50 = vand.u32 4294901760, %v1027_v41 }
 0x224   : > { %v1108_v0 = vand.u32 4294901760, %v1107_v55 }
 0x225   : > { %v2174_v63 = vand.u32 4294901760, %v938_v54  ;;  %v1181_v43 = vand.u32 4294901760, %v1180_v29 }
 0x227   : > { %v1172_v13 = vsub.f32 %v938_v54, %v2174_v63  ;;  %v952_v54 = vld [vmem:[%s2591_s3 + $0x60] sm:$0xff] }
 0x228   : > { %v933_v2 = vpop.f32.mrf.mxu3  ;;  %v993_v58 = vsel %vm326_vm0, %v952_v54, 0 }
 0x229   : > { %v934_v5 = vadd.f32 %v933_v2, %v897_v62  ;;  %v1173_v21 = vand.u32 4294901760, %v1172_v13  ;;  %v966_v62 = vsel %vm326_vm0, %v943_v57, 0  ;;  %v1114_v2 = vand.u32 4294901760, %v2257_v56 }
 0x22b   : > { %v939_v12 = vmax.f32 %v934_v5, 0.0  ;;  %v1174_v28 = vsub.f32 %v1172_v13, %v1173_v21  ;;  %v2277_v5 = vand.u32 4294901760, %v993_v58  ;;  %v1115_v15 = vsub.f32 %v2257_v56, %v1114_v2 }
 0x22d   : > { %v2191_v9 = vand.u32 4294901760, %v939_v12  ;;  %v1175_v38 = vand.u32 4294901760, %v1174_v28  ;;  %v945_v28 = vld [vmem:[%s2591_s3 + $0x28] sm:$0xff] }
 0x22e   : > { %v972_v29 = vsel %vm326_vm0, %v945_v28, 0 }
 0x22f   : > { %v1166_v20 = vsub.f32 %v939_v12, %v2191_v9  ;;  %1017 = vmatpush.msrb.mxu0 %v2191_v9  ;;  %1923 = vmatpush.msrb.mxu2 %v2191_v9  ;;  %v1042_v12 = vand.u32 4294901760, %v2270_v61  ;;  %v2340_v41 = vand.u32 4294901760, %v972_v29 }
 0x231   : > { %1019 = vmatpush.msrb.mxu0 %v2174_v63  ;;  %1924 = vmatpush.msrb.mxu2 %v2174_v63  ;;  %v1167_v7 = vand.u32 4294901760, %v1166_v20  ;;  %v2360_v55 = vsub.f32 %v972_v29, %v2340_v41 }
 0x233   : > { %1021 = vmatpush.msrb.mxu0 %v2177_v3  ;;  %1925 = vmatpush.msrb.mxu2 %v2177_v3  ;;  %v1168_v27 = vsub.f32 %v1166_v20, %v1167_v7 }
 0x235   : > { %1023 = vmatpush.msrb.mxu0 %v2183_v11  ;;  %1926 = vmatpush.msrb.mxu2 %v2183_v11  ;;  %v1169_v34 = vand.u32 4294901760, %v1168_v27 }
 0x236   : > { %1093 = vmatmul.f32.vlgmr.msrb.gmra.mxu2 %v1092_v33  ;;  %1029 = vmatmul.f32.vlgmr.msrb.gmra.mxu0 %v1028_v50 }
 0x237   : > { %1491 = vmatpush.msra.mxu0 %v1167_v7  ;;  %1268 = vmatpush.msra.mxu2 %v1166_v20  ;;  %v1116_v20 = vand.u32 4294901760, %v1115_v15 }
 0x238   : > { %1170 = vmatpush.msrb.mxu1 %v1169_v34  ;;  %1927 = vmatpush.msrb.mxu3 %v1169_v34 }
 0x239   : > { %1495 = vmatpush.msra.mxu0 %v1173_v21  ;;  %1271 = vmatpush.msra.mxu2 %v1172_v13  ;;  %v2282_v13 = vand.u32 4294901760, %v966_v62 }
 0x23a   : > { %1176 = vmatpush.msrb.mxu1 %v1175_v38  ;;  %1928 = vmatpush.msrb.mxu3 %v1175_v38 }
 0x23b   : > { %1499 = vmatpush.msra.mxu0 %v1179_v24  ;;  %1274 = vmatpush.msra.mxu2 %v1178_v16  ;;  %v2304_v17 = vsub.f32 %v966_v62, %v2282_v13 }
 0x23c   : > { %1182 = vmatpush.msrb.mxu1 %v1181_v43  ;;  %1929 = vmatpush.msrb.mxu3 %v1181_v43  ;;  %v955_v43 = vld [vmem:[%s2591_s3 + $0x78] sm:$0xff] }
 0x23d   : > { %1503 = vmatpush.msra.mxu0 %v1185_v30  ;;  %1277 = vmatpush.msra.mxu2 %v1184_v22  ;;  %v1050_v7 = vand.u32 4294901760, %v2304_v17  ;;  %v999_v30 = vsel %vm326_vm0, %v954_v1, 0  ;;  %v1002_v50 = vsel %vm326_vm0, %v955_v43, 0 }
 0x23e   : > { %1188 = vmatpush.msrb.mxu1 %v1187_v49  ;;  %1930 = vmatpush.msrb.mxu3 %v1187_v49  ;;  %v2337_v38 = vand.u32 4294901760, %v999_v30  ;;  %v946_v49 = vld [vmem:[%s2591_s3 + $0x30] sm:$0xff]  ;;  %v2365_v62 = vand.u32 4294901760, %v1002_v50 }
 0x23f   : > { %1101 = vmatmul.f32.gmra.mxu2 %v1100_v46  ;;  %1222 = vmatmul.f32.vlgmr.msrb.gmra.mxu3 %v2163_v52  ;;  %v1051_v32 = vsub.f32 %v2304_v17, %v1050_v7  ;;  %v975_v57 = vsel %vm326_vm0, %v946_v49, 0 }
 0x240   : > { %1582 = vmatpush.msra.mxu1 %v2191_v9  ;;  %1372 = vmatpush.msra.mxu3 %v2191_v9  ;;  %v944_v9 = vld [vmem:[%s2591_s3 + $0x20] sm:$0xff]  ;;  %v2349_v46 = vsub.f32 %v999_v30, %v2337_v38 }
 0x241   : > { %1190 = vmatmul.f32.vlgmr.msrb.gmra.mxu1 %v2186_v14  ;;  %1037 = vmatmul.f32.gmra.mxu0 %v1036_v6  ;;  %v969_v19 = vsel %vm326_vm0, %v944_v9, 0  ;;  %v1052_v39 = vand.u32 4294901760, %v1051_v32  ;;  %v1066_v6 = vand.u32 4294901760, %v2360_v55  ;;  %v2372_v9 = vsub.f32 %v1002_v50, %v2365_v62 }
 0x242   : > { %1584 = vmatpush.msra.mxu1 %v2174_v63  ;;  %1374 = vmatpush.msra.mxu3 %v2174_v63  ;;  %v953_v63 = vld [vmem:[%s2591_s3 + $0x68] sm:$0xff]  ;;  %v2312_v24 = vand.u32 4294901760, %v969_v19  ;;  %v1138_v60 = vand.u32 4294901760, %v2349_v46 }
 0x243   : > { %v996_v16 = vsel %vm326_vm0, %v953_v63, 0  ;;  %v1072_v63 = vand.u32 4294901760, %v975_v57  ;;  %v1146_v1 = vand.u32 4294901760, %v2372_v9 }
 0x244   : > { %1586 = vmatpush.msra.mxu1 %v2177_v3  ;;  %1376 = vmatpush.msra.mxu3 %v2177_v3  ;;  %v2293_v3 = vsub.f32 %v993_v58, %v2277_v5  ;;  %v2309_v22 = vand.u32 4294901760, %v996_v16  ;;  %v2332_v34 = vsub.f32 %v969_v19, %v2312_v24  ;;  %v1139_v15 = vsub.f32 %v2349_v46, %v1138_v60 }
 0x245   : > { %v1073_v19 = vsub.f32 %v975_v57, %v1072_v63  ;;  %v1147_v32 = vsub.f32 %v2372_v9, %v1146_v1 }
 0x246   : > { %1588 = vmatpush.msra.mxu1 %v2183_v11  ;;  %1378 = vmatpush.msra.mxu3 %v2183_v11  ;;  %v1043_v11 = vsub.f32 %v2270_v61, %v1042_v12  ;;  %v1122_v21 = vand.u32 4294901760, %v2293_v3  ;;  %v2321_v27 = vsub.f32 %v996_v16, %v2309_v22  ;;  %v1058_v40 = vand.u32 4294901760, %v2332_v34  ;;  %v947_v16 = vld [vmem:[%s2591_s3 + $0x38] sm:$0xff] }
 0x247   : > { %1109 = vmatmul.f32.gmra.mxu2 %v1108_v0  ;;  %1226 = vmatmul.f32.gmra.mxu3 %v2181_v10  ;;  %v1074_v28 = vand.u32 4294901760, %v1073_v19 }
 0x248   : > { %v1044_v23 = vand.u32 4294901760, %v1043_v11  ;;  %v1123_v33 = vsub.f32 %v2293_v3, %v1122_v21  ;;  %v1130_v37 = vand.u32 4294901760, %v2321_v27  ;;  %v1059_v54 = vsub.f32 %v2332_v34, %v1058_v40 }
 0x249   : > { %1194 = vmatmul.f32.gmra.mxu1 %v2220_v31  ;;  %v1067_v11 = vsub.f32 %v2360_v55, %v1066_v6  ;;  %v1075_v29 = vsub.f32 %v1073_v19, %v1074_v28 }
 0x24a   : > { %1045 = vmatmul.f32.gmra.mxu0 %v1044_v23  ;;  %v1124_v35 = vand.u32 4294901760, %v1123_v33  ;;  %v1131_v45 = vsub.f32 %v2321_v27, %v1130_v37  ;;  %v1060_v0 = vand.u32 4294901760, %v1059_v54  ;;  %v1140_v23 = vand.u32 4294901760, %v1139_v15 }
 0x24b   : > { %v1068_v33 = vand.u32 4294901760, %v1067_v11  ;;  %v1076_v43 = vand.u32 4294901760, %v1075_v29 }
 0x24c   : > { %v1132_v58 = vand.u32 4294901760, %v1131_v45 }
 0x24f   : > { %1117 = vmatmul.f32.gmra.mxu2 %v1116_v20  ;;  %1230 = vmatmul.f32.gmra.mxu3 %v2215_v26  ;;  %v978_v20 = vsel %vm326_vm0, %v947_v16, 0 }
 0x250   : > { %v1080_v30 = vand.u32 4294901760, %v978_v20 }
 0x251   : > { %1198 = vmatmul.f32.gmra.mxu1 %v2248_v53 }
 0x252   : > { %1053 = vmatmul.f32.gmra.mxu0 %v1052_v39  ;;  %v1148_v39 = vand.u32 4294901760, %v1147_v32 }
 0x257   : > { %1125 = vmatmul.f32.gmra.mxu2 %v1124_v35  ;;  %1234 = vmatmul.f32.gmra.mxu3 %v2245_v48  ;;  %v1081_v35 = vsub.f32 %v978_v20, %v1080_v30 }
 0x259   : > { %1202 = vmatmul.f32.gmra.mxu1 %v2282_v13  ;;  %v1082_v45 = vand.u32 4294901760, %v1081_v35 }
 0x25a   : > { %1061 = vmatmul.f32.gmra.mxu0 %v1060_v0 }
 0x25b   : > { %v1083_v49 = vsub.f32 %v1081_v35, %v1082_v45 }
 0x25d   : > { %v1084_v50 = vand.u32 4294901760, %v1083_v49 }
 0x25f   : > { %1133 = vmatmul.f32.gmra.mxu2 %v1132_v58  ;;  %1238 = vmatmul.f32.gmra.mxu3 %v2277_v5 }
 0x261   : > { %1206 = vmatmul.f32.gmra.mxu1 %v2312_v24 }
 0x262   : > { %1069 = vmatmul.f32.gmra.mxu0 %v1068_v33 }
 0x267   : > { %1141 = vmatmul.f32.gmra.mxu2 %v1140_v23  ;;  %1242 = vmatmul.f32.gmra.mxu3 %v2309_v22 }
 0x269   : > { %1210 = vmatmul.f32.gmra.mxu1 %v2340_v41 }
 0x26a   : > { %1077 = vmatmul.f32.gmra.mxu0 %v1076_v43 }
 0x26f   : > { %1149 = vmatmul.f32.gmra.mxu2 %v1148_v39  ;;  %1246 = vmatmul.f32.gmra.mxu3 %v2337_v38 }
 0x271   : > { %1214 = vmatmul.f32.gmra.mxu1 %v1072_v63 }
 0x272   : > { %1085 = vmatmul.f32.gmra.mxu0 %v1084_v50 }
 0x277   : > { %1280 = vmatmul.f32.vlgmr.msra.gmra.mxu2 %v2209_v44  ;;  %1250 = vmatmul.f32.gmra.mxu3 %v2365_v62 }
 0x279   : > { %1218 = vmatmul.f32.gmra.mxu1 %v1080_v30 }
 0x27a   : > { %1505 = vmatmul.f32.vlgmr.msra.gmra.mxu0 %v2186_v14 }
 0x27f   : > { %1285 = vmatmul.f32.gmra.mxu2 %v2241_v42  ;;  %1382 = vmatmul.f32.vlgmr.msra.gmra.mxu3 %v1026_v4 }
 0x281   : > { %1590 = vmatmul.f32.vlgmr.msra.gmra.mxu1 %v2186_v14 }
 0x282   : > { %1509 = vmatmul.f32.gmra.mxu0 %v2220_v31 }
 0x287   : > { %1290 = vmatmul.f32.gmra.mxu2 %v2270_v61  ;;  %1388 = vmatmul.f32.gmra.mxu3 %v1034_v51 }
 0x289   : > { %1594 = vmatmul.f32.gmra.mxu1 %v2220_v31 }
 0x28a   : > { %1513 = vmatmul.f32.gmra.mxu0 %v2248_v53 }
 0x28f   : > { %1295 = vmatmul.f32.gmra.mxu2 %v2304_v17  ;;  %1394 = vmatmul.f32.gmra.mxu3 %v1042_v12 }
 0x291   : > { %1598 = vmatmul.f32.gmra.mxu1 %v2248_v53 }
 0x292   : > { %1517 = vmatmul.f32.gmra.mxu0 %v2282_v13 }
 0x297   : > { %1300 = vmatmul.f32.gmra.mxu2 %v2332_v34  ;;  %1400 = vmatmul.f32.gmra.mxu3 %v1050_v7 }
 0x299   : > { %1602 = vmatmul.f32.gmra.mxu1 %v2282_v13 }
 0x29a   : > { %1521 = vmatmul.f32.gmra.mxu0 %v2312_v24 }
 0x29f   : > { %1305 = vmatmul.f32.gmra.mxu2 %v2360_v55  ;;  %1406 = vmatmul.f32.gmra.mxu3 %v1058_v40 }
 0x2a1   : > { %1606 = vmatmul.f32.gmra.mxu1 %v2312_v24 }
 0x2a2   : > { %1525 = vmatmul.f32.gmra.mxu0 %v2340_v41 }
 0x2a7   : > { %1310 = vmatmul.f32.gmra.mxu2 %v1073_v19  ;;  %1412 = vmatmul.f32.gmra.mxu3 %v1066_v6 }
 0x2a9   : > { %1610 = vmatmul.f32.gmra.mxu1 %v2340_v41 }
 0x2aa   : > { %1529 = vmatmul.f32.gmra.mxu0 %v1072_v63 }
 0x2af   : > { %1315 = vmatmul.f32.gmra.mxu2 %v1081_v35  ;;  %1418 = vmatmul.f32.gmra.mxu3 %v1074_v28 }
 0x2b1   : > { %1614 = vmatmul.f32.gmra.mxu1 %v1072_v63 }
 0x2b2   : > { %1533 = vmatmul.f32.gmra.mxu0 %v1080_v30 }
 0x2b3   : > { %v2418_v44 = vpop.f32.mrf.mxu0 }
 0x2b7   : > { %1320 = vmatmul.f32.gmra.mxu2 %v2169_v59  ;;  %1424 = vmatmul.f32.gmra.mxu3 %v1082_v45 }
 0x2b9   : > { %v1094_v14 = vpop.f32.mrf.mxu2  ;;  %1618 = vmatmul.f32.gmra.mxu1 %v1080_v30 }
 0x2ba   : > { %1537 = vmatmul.f32.gmra.mxu0 %v2163_v52 }
 0x2be   : > { %v2423_v4 = vpop.f32.mrf.mxu1  ;;  %v2429_v53 = vpop.f32.mrf.mxu0 }
 0x2bf   : > { %1325 = vmatmul.f32.gmra.mxu2 %v2198_v18  ;;  %1430 = vmatmul.f32.gmra.mxu3 %v1090_v8 }
 0x2c1   : > { %1622 = vmatmul.f32.gmra.mxu1 %v2163_v52 }
 0x2c2   : > { %v1102_v31 = vpop.f32.mrf.mxu2  ;;  %v1223_v42 = vpop.f32.mrf.mxu3  ;;  %1541 = vmatmul.f32.gmra.mxu0 %v2181_v10 }
 0x2c3   : > { %v2427_v51 = vadd.f32 %v1223_v42, %v1094_v14 }
 0x2c6   : > { %v2434_v61 = vpop.f32.mrf.mxu1 }
 0x2c7   : > { %1330 = vmatmul.f32.gmra.mxu2 %v2231_v36  ;;  %1436 = vmatmul.f32.gmra.mxu3 %v1098_v25  ;;  %v2440_v52 = vpop.f32.mrf.mxu0  ;;  %v1196_v23 = vadd.f32 %v2434_v61, %v2429_v53 }
 0x2c9   : > { %1626 = vmatmul.f32.gmra.mxu1 %v2181_v10 }
 0x2ca   : > { %v1110_v59 = vpop.f32.mrf.mxu2  ;;  %v1227_v8 = vpop.f32.mrf.mxu3  ;;  %1545 = vmatmul.f32.gmra.mxu0 %v2215_v26 }
 0x2cb   : > { %v2438_v12 = vadd.f32 %v1227_v8, %v1102_v31 }
 0x2ce   : > { %v2445_v13 = vpop.f32.mrf.mxu1 }
 0x2cf   : > { %1335 = vmatmul.f32.gmra.mxu2 %v2257_v56  ;;  %1442 = vmatmul.f32.gmra.mxu3 %v1106_v47  ;;  %v2451_v10 = vpop.f32.mrf.mxu0  ;;  %v1200_v39 = vadd.f32 %v2445_v13, %v2440_v52 }
 0x2d1   : > { %1630 = vmatmul.f32.gmra.mxu1 %v2215_v26 }
 0x2d2   : > { %v1118_v18 = vpop.f32.mrf.mxu2  ;;  %v1231_v25 = vpop.f32.mrf.mxu3  ;;  %1549 = vmatmul.f32.gmra.mxu0 %v2245_v48 }
 0x2d3   : > { %v2449_v17 = vadd.f32 %v1231_v25, %v1110_v59 }
 0x2d6   : > { %v2456_v7 = vpop.f32.mrf.mxu1 }
 0x2d7   : > { %1340 = vmatmul.f32.gmra.mxu2 %v2293_v3  ;;  %1448 = vmatmul.f32.gmra.mxu3 %v1114_v2  ;;  %v2462_v26 = vpop.f32.mrf.mxu0  ;;  %v1204_v42 = vadd.f32 %v2456_v7, %v2451_v10 }
 0x2d9   : > { %1634 = vmatmul.f32.gmra.mxu1 %v2245_v48 }
 0x2da   : > { %v1126_v36 = vpop.f32.mrf.mxu2  ;;  %v1235_v47 = vpop.f32.mrf.mxu3  ;;  %1553 = vmatmul.f32.gmra.mxu0 %v2277_v5 }
 0x2db   : > { %v2460_v24 = vadd.f32 %v1235_v47, %v1118_v18 }
 0x2de   : > { %v2467_v34 = vpop.f32.mrf.mxu1 }
 0x2df   : > { %1345 = vmatmul.f32.gmra.mxu2 %v2321_v27  ;;  %1454 = vmatmul.f32.gmra.mxu3 %v1122_v21  ;;  %v2473_v48 = vpop.f32.mrf.mxu0 }
 0x2e1   : > { %1638 = vmatmul.f32.gmra.mxu1 %v2277_v5 }
 0x2e2   : > { %v1134_v56 = vpop.f32.mrf.mxu2  ;;  %v1239_v2 = vpop.f32.mrf.mxu3  ;;  %1557 = vmatmul.f32.gmra.mxu0 %v2309_v22 }
 0x2e3   : > { %v2471_v40 = vadd.f32 %v1239_v2, %v1126_v36  ;;  %v1208_v36 = vadd.f32 %v2467_v34, %v2462_v26 }
 0x2e6   : > { %v2478_v41 = vpop.f32.mrf.mxu1 }
 0x2e7   : > { %1350 = vmatmul.f32.gmra.mxu2 %v2349_v46  ;;  %1460 = vmatmul.f32.gmra.mxu3 %v1130_v37  ;;  %v2484_v5 = vpop.f32.mrf.mxu0 }
 0x2e9   : > { %1642 = vmatmul.f32.gmra.mxu1 %v2309_v22 }
 0x2ea   : > { %v1142_v3 = vpop.f32.mrf.mxu2  ;;  %v1243_v21 = vpop.f32.mrf.mxu3  ;;  %1561 = vmatmul.f32.gmra.mxu0 %v2337_v38 }
 0x2eb   : > { %v2482_v54 = vadd.f32 %v1243_v21, %v1134_v56 }
 0x2ee   : > { %v2489_v55 = vpop.f32.mrf.mxu1 }
 0x2ef   : > { %1355 = vmatmul.f32.gmra.mxu2 %v2372_v9  ;;  %1466 = vmatmul.f32.gmra.mxu3 %v1138_v60  ;;  %v2495_v22 = vpop.f32.mrf.mxu0 }
 0x2f1   : > { %1646 = vmatmul.f32.gmra.mxu1 %v2337_v38  ;;  %v1192_v38 = vadd.f32 %v2423_v4, %v2418_v44 }
 0x2f2   : > { %v1150_v27 = vpop.f32.mrf.mxu2  ;;  %v1247_v37 = vpop.f32.mrf.mxu3  ;;  %1565 = vmatmul.f32.gmra.mxu0 %v2365_v62 }
 0x2f3   : > { %v2493_v57 = vadd.f32 %v1247_v37, %v1142_v3  ;;  %v1212_v37 = vadd.f32 %v2478_v41, %v2473_v48 }
 0x2f6   : > { %v2499_v58 = vpop.f32.mrf.mxu1 }
 0x2f7   : > { %1472 = vmatmul.f32.gmra.mxu3 %v1146_v1  ;;  %v1506_v6 = vpop.f32.mrf.mxu0 }
 0x2f9   : > { %1650 = vmatmul.f32.gmra.mxu1 %v2365_v62 }
 0x2fa   : > { %v1281_v46 = vpop.f32.mrf.mxu2  ;;  %v1251_v60 = vpop.f32.mrf.mxu3 }
 0x2fb   : > { %v2503_v0 = vadd.f32 %v1251_v60, %v1150_v27  ;;  %v1282_v15 = vadd.f32 %v1281_v46, %v1192_v38 }
 0x2fe   : > { %v1591_v63 = vpop.f32.mrf.mxu1 }
 0x2ff   : > { %v1510_v20 = vpop.f32.mrf.mxu0 }
 0x302   : > { %v1286_v16 = vpop.f32.mrf.mxu2  ;;  %v1383_v11 = vpop.f32.mrf.mxu3 }
 0x303   : > { %v1384_v9 = vadd.f32 %v1383_v11, %v1282_v15  ;;  %v1287_v28 = vadd.f32 %v1286_v16, %v1196_v23  ;;  %v1216_v16 = vadd.f32 %v2489_v55, %v2484_v5 }
 0x305   : > { %v1507_v19 = vadd.f32 %v1506_v6, %v1384_v9 }
 0x306   : > { %v1595_v33 = vpop.f32.mrf.mxu1 }
 0x307   : > { %v1592_v1 = vadd.f32 %v1591_v63, %v1507_v19  ;;  %v1514_v35 = vpop.f32.mrf.mxu0 }
 0x309   : > { %1691 = vperm.xlu0 %1941, %v1592_v1  }
 0x30a   : > { %v1291_v62 = vpop.f32.mrf.mxu2  ;;  %v1389_v30 = vpop.f32.mrf.mxu3 }
 0x30b   : > { %v1390_v32 = vadd.f32 %v1389_v30, %v1287_v28  ;;  %v1292_v49 = vadd.f32 %v1291_v62, %v1200_v39 }
 0x30d   : > { %v1511_v29 = vadd.f32 %v1510_v20, %v1390_v32 }
 0x30e   : > { %v1599_v45 = vpop.f32.mrf.mxu1 }
 0x30f   : > { %v1596_v43 = vadd.f32 %v1595_v33, %v1511_v29  ;;  %v1518_v31 = vpop.f32.mrf.mxu0  ;;  %v1220_v33 = vadd.f32 %v2499_v58, %v2495_v22 }
 0x311   : > { %1696 = vperm.xlu1 %1942, %v1596_v43  }
 0x312   : > { %v1296_v50 = vpop.f32.mrf.mxu2  ;;  %v1395_v14 = vpop.f32.mrf.mxu3 }
 0x313   : > { %v1396_v44 = vadd.f32 %v1395_v14, %v1292_v49  ;;  %v1297_v59 = vadd.f32 %v1296_v50, %v1204_v42 }
 0x315   : > { %v1515_v4 = vadd.f32 %v1514_v35, %v1396_v44 }
 0x316   : > { %v1603_v61 = vpop.f32.mrf.mxu1 }
 0x317   : > { %v1600_v53 = vadd.f32 %v1599_v45, %v1515_v4  ;;  %v1522_v13 = vpop.f32.mrf.mxu0 }
 0x319   : > { %1701 = vperm.xlu2 %1943, %v1600_v53  }
 0x31a   : > { %v1301_v8 = vpop.f32.mrf.mxu2  ;;  %v1401_v18 = vpop.f32.mrf.mxu3 }
 0x31b   : > { %v1402_v25 = vadd.f32 %v1401_v18, %v1297_v59  ;;  %v1302_v2 = vadd.f32 %v1301_v8, %v1208_v36 }
 0x31d   : > { %v1519_v52 = vadd.f32 %v1518_v31, %v1402_v25 }
 0x31e   : > { %v1607_v56 = vpop.f32.mrf.mxu1 }
 0x31f   : > { %v1604_v47 = vadd.f32 %v1603_v61, %v1519_v52  ;;  %v1526_v7 = vpop.f32.mrf.mxu0 }
 0x321   : > { %1706 = vperm.xlu2 %1943, %v1604_v47  }
 0x322   : > { %v1306_v3 = vpop.f32.mrf.mxu2  ;;  %v1407_v21 = vpop.f32.mrf.mxu3 }
 0x323   : > { %v1408_v27 = vadd.f32 %v1407_v21, %v1302_v2  ;;  %v1307_v6 = vadd.f32 %v1306_v3, %v1212_v37 }
 0x325   : > { %v1523_v10 = vadd.f32 %v1522_v13, %v1408_v27 }
 0x326   : > { %v1611_v60 = vpop.f32.mrf.mxu1 }
 0x327   : > { %v1608_v46 = vadd.f32 %v1607_v56, %v1523_v10  ;;  %v1530_v34 = vpop.f32.mrf.mxu0 }
 0x329   : > { %1711 = vperm.xlu0 %1941, %v1608_v46  }
 0x32a   : > { %v1311_v38 = vpop.f32.mrf.mxu2  ;;  %v1413_v63 = vpop.f32.mrf.mxu3 }
 0x32b   : > { %v1414_v15 = vadd.f32 %v1413_v63, %v1307_v6  ;;  %v1312_v19 = vadd.f32 %v1311_v38, %v1216_v16 }
 0x32d   : > { %v1527_v26 = vadd.f32 %v1526_v7, %v1414_v15 }
 0x32e   : > { %v1615_v9 = vpop.f32.mrf.mxu1 }
 0x32f   : > { %v1612_v11 = vadd.f32 %v1611_v60, %v1527_v26  ;;  %v1534_v41 = vpop.f32.mrf.mxu0 }
 0x331   : > { %1716 = vperm.xlu2 %1943, %v1612_v11  }
 0x332   : > { %v1316_v20 = vpop.f32.mrf.mxu2  ;;  %v1419_v23 = vpop.f32.mrf.mxu3 }
 0x333   : > { %v1420_v1 = vadd.f32 %v1419_v23, %v1312_v19  ;;  %v1317_v30 = vadd.f32 %v1316_v20, %v1220_v33 }
 0x335   : > { %v1531_v48 = vadd.f32 %v1530_v34, %v1420_v1 }
 0x336   : > { %v1619_v62 = vpop.f32.mrf.mxu1 }
 0x337   : > { %v1616_v28 = vadd.f32 %v1615_v9, %v1531_v48  ;;  %v1538_v55 = vpop.f32.mrf.mxu0 }
 0x339   : > { %1721 = vperm.xlu1 %1942, %v1616_v28  }
 0x33a   : > { %v1321_v32 = vpop.f32.mrf.mxu2  ;;  %v1425_v29 = vpop.f32.mrf.mxu3 }
 0x33b   : > { %v1426_v35 = vadd.f32 %v1425_v29, %v1317_v30  ;;  %v1322_v45 = vadd.f32 %v1321_v32, %v2427_v51 }
 0x33d   : > { %v1535_v5 = vadd.f32 %v1534_v41, %v1426_v35 }
 0x33e   : > { %v1623_v43 = vpop.f32.mrf.mxu1 }
 0x33f   : > { %v1620_v39 = vadd.f32 %v1619_v62, %v1535_v5  ;;  %v1542_v4 = vpop.f32.mrf.mxu0 }
 0x341   : > { %1726 = vperm.xlu0 %1941, %v1620_v39  }
 0x342   : > { %v1326_v49 = vpop.f32.mrf.mxu2  ;;  %v1431_v50 = vpop.f32.mrf.mxu3 }
 0x343   : > { %v1432_v14 = vadd.f32 %v1431_v50, %v1322_v45  ;;  %v1327_v31 = vadd.f32 %v1326_v49, %v2438_v12 }
 0x345   : > { %v1539_v44 = vadd.f32 %v1538_v55, %v1432_v14 }
 0x346   : > { %v1627_v58 = vpop.f32.mrf.mxu1 }
 0x347   : > { %v1624_v22 = vadd.f32 %v1623_v43, %v1539_v44  ;;  %v1546_v8 = vpop.f32.mrf.mxu0  ;;  %v1654_v43 = vlaneseq }
 0x349   : > { %1731 = vperm.xlu2 %1943, %v1624_v22   ;;  %v2529_v45 = vshrl.u32 %v1654_v43, 7  ;;  %v2532_v49 = vand.u32 127, %v1654_v43 }
 0x34a   : > { %v1331_v42 = vpop.f32.mrf.mxu2  ;;  %v1437_v53 = vpop.f32.mrf.mxu3 }
 0x34b   : > { %v1438_v61 = vadd.f32 %v1437_v53, %v1327_v31  ;;  %v1332_v51 = vadd.f32 %v1331_v42, %v2449_v17  ;;  %vm1673_vm3 = vcmp.eq.s32.totalorder %v2529_v45, %v2532_v49  ;;  %v1659_v42 = vadd.s32 32, %v2529_v45 }
 0x34d   : > { %v1543_v59 = vadd.f32 %v1542_v4, %v1438_v61  ;;  %vm1677_vm6 = vcmp.eq.s32.totalorder %v1659_v42, %v2532_v49 }
 0x34e   : > { %v1631_v25 = vpop.f32.mrf.mxu1 }
 0x34f   : > { %v1628_v18 = vadd.f32 %v1627_v58, %v1543_v59  ;;  %v1550_v56 = vpop.f32.mrf.mxu0  ;;  %v1658_v58 = vadd.s32 24, %v2529_v45 }
 0x351   : > { %1736 = vperm.xlu1 %1942, %v1628_v18   ;;  %vm1676_vm5 = vcmp.eq.s32.totalorder %v1658_v58, %v2532_v49  ;;  %v1660_v18 = vadd.s32 40, %v2529_v45 }
 0x352   : > { %v1336_v52 = vpop.f32.mrf.mxu2  ;;  %v1443_v13 = vpop.f32.mrf.mxu3 }
 0x353   : > { %v1444_v36 = vadd.f32 %v1443_v13, %v1332_v51  ;;  %v1337_v12 = vadd.f32 %v1336_v52, %v2460_v24  ;;  %vm1678_vm7 = vcmp.eq.s32.totalorder %v1660_v18, %v2532_v49 }
 0x355   : > { %v1547_v47 = vadd.f32 %v1546_v8, %v1444_v36  ;;  %v1662_v36 = vadd.s32 56, %v2529_v45 }
 0x356   : > { %v1635_v3 = vpop.f32.mrf.mxu1 }
 0x357   : > { %v1632_v2 = vadd.f32 %v1631_v25, %v1547_v47  ;;  %v1554_v37 = vpop.f32.mrf.mxu0  ;;  %v1661_v25 = vadd.s32 48, %v2529_v45  ;;  %vm1680_vm9 = vcmp.eq.s32.totalorder %v1662_v36, %v2532_v49 }
 0x359   : > { %1741 = vperm.xlu0 %1941, %v1632_v2   ;;  %vm1679_vm8 = vcmp.eq.s32.totalorder %v1661_v25, %v2532_v49 }
 0x35a   : > { %v1341_v21 = vpop.f32.mrf.mxu2  ;;  %v1449_v27 = vpop.f32.mrf.mxu3 }
 0x35b   : > { %v1450_v10 = vadd.f32 %v1449_v27, %v1337_v12  ;;  %v1342_v17 = vadd.f32 %v1341_v21, %v2471_v40  ;;  %v1663_v27 = vadd.s32 64, %v2529_v45 }
 0x35d   : > { %v1551_v7 = vadd.f32 %v1550_v56, %v1450_v10  ;;  %vm1681_vm10 = vcmp.eq.s32.totalorder %v1663_v27, %v2532_v49  ;;  %v1832_v27 = vld [vmem:[%s2592_s4 + $0x2] sm:$0x1] }
 0x35e   : > { %v1639_v60 = vpop.f32.mrf.mxu1 }
 0x35f   : > { %v1636_v46 = vadd.f32 %v1635_v3, %v1551_v7  ;;  %v1558_v26 = vpop.f32.mrf.mxu0  ;;  %v1664_v7 = vadd.s32 72, %v2529_v45 }
 0x361   : > { %1746 = vperm.xlu2 %1943, %v1636_v46   ;;  %vm1682_vm11 = vcmp.eq.s32.totalorder %v1664_v7, %v2532_v49 }
 0x362   : > { %v1346_v6 = vpop.f32.mrf.mxu2  ;;  %v1455_v38 = vpop.f32.mrf.mxu3 }
 0x363   : > { %v1456_v63 = vadd.f32 %v1455_v38, %v1342_v17  ;;  %v1347_v24 = vadd.f32 %v1346_v6, %v2482_v54 }
 0x365   : > { %v1555_v15 = vadd.f32 %v1554_v37, %v1456_v63 }
 0x366   : > { %v1643_v16 = vpop.f32.mrf.mxu1 }
 0x367   : > { %v1640_v34 = vadd.f32 %v1639_v60, %v1555_v15  ;;  %v1562_v1 = vpop.f32.mrf.mxu0  ;;  %v1665_v60 = vadd.s32 80, %v2529_v45 }
 0x369   : > { %1751 = vperm.xlu1 %1942, %v1640_v34   ;;  %vm1683_vm12 = vcmp.eq.s32.totalorder %v1665_v60, %v2532_v49  ;;  %v1666_v34 = vadd.s32 88, %v2529_v45 }
 0x36a   : > { %v1461_v11 = vpop.f32.mrf.mxu3  ;;  %v1351_v19 = vpop.f32.mrf.mxu2 }
 0x36b   : > { %v1462_v9 = vadd.f32 %v1461_v11, %v1347_v24  ;;  %v1352_v48 = vadd.f32 %v1351_v19, %v2493_v57  ;;  %v1656_v57 = vadd.s32 8, %v2529_v45  ;;  %v1667_v24 = vadd.s32 96, %v2529_v45 }
 0x36c   : > { %v1668_v19 = vadd.s32 104, %v2529_v45  ;;  %vm1684_vm13 = vcmp.eq.s32.totalorder %v1666_v34, %v2532_v49 }
 0x36d   : > { %v1559_v20 = vadd.f32 %v1558_v26, %v1462_v9  ;;  %vm1674_vm2 = vcmp.eq.s32.totalorder %v1656_v57, %v2532_v49  ;;  %vm1685_vm14 = vcmp.eq.s32.totalorder %v1667_v24, %v2532_v49 }
 0x36e   : > { %v1647_v41 = vpop.f32.mrf.mxu1  ;;  %vm1686_vm15 = vcmp.eq.s32.totalorder %v1668_v19, %v2532_v49 }
 0x36f   : > { %v1644_v23 = vadd.f32 %v1643_v16, %v1559_v20  ;;  %v1566_v29 = vpop.f32.mrf.mxu0 }
 0x371   : > { %1756 = vperm.xlu0 %1941, %v1644_v23  }
 0x372   : > { %v1467_v40 = vpop.f32.mrf.mxu3  ;;  %v1356_v62 = vpop.f32.mrf.mxu2 }
 0x373   : > { %v1468_v33 = vadd.f32 %v1467_v40, %v1352_v48  ;;  %v1357_v32 = vadd.f32 %v1356_v62, %v2503_v0  ;;  %v1702_v50 = vpop.permute.xlu2 %1701  ;;  %v1657_v0 = vadd.s32 16, %v2529_v45 }
 0x375   : > { %v1563_v28 = vadd.f32 %v1562_v1, %v1468_v33  ;;  %vm1675_vm4 = vcmp.eq.s32.totalorder %v1657_v0, %v2532_v49  ;;  %v1669_v33 = vadd.s32 112, %v2529_v45 }
 0x376   : > { %v1651_v5 = vpop.f32.mrf.mxu1  ;;  %v1771_v61 = vsel %vm1675_vm4, %v1702_v50, 0.0 }
 0x377   : > { %v1648_v30 = vadd.f32 %v1647_v41, %v1563_v28  ;;  %vm1687_vm0 = vcmp.eq.s32.totalorder %v1669_v33, %v2532_v49 }
 0x379   : > { %1761 = vperm.xlu2 %1943, %v1648_v30  }
 0x37a   : > { %v1473_v54 = vpop.f32.mrf.mxu3 }
 0x37b   : > { %v1474_v35 = vadd.f32 %v1473_v54, %v1357_v32  ;;  %v1692_v44 = vpop.permute.xlu0 %1691  ;;  %v1707_v53 = vpop.permute.xlu2 %1706  ;;  %v1670_v32 = vadd.s32 120, %v2529_v45  ;;  %v1806_v45 = vld [vmem:[%s2592_s4] sm:$0x1] }
 0x37c   : > { %v1769_v22 = vsel %vm1673_vm3, %v1692_v44, 0.0  ;;  %v1772_v51 = vsel %vm1676_vm5, %v1707_v53, 0.0 }
 0x37d   : > { %v1567_v55 = vadd.f32 %v1566_v29, %v1474_v35  ;;  %vm1688_vm1 = vcmp.eq.s32.totalorder %v1670_v32, %v2532_v49 }
 0x37f   : > { %v1652_v39 = vadd.f32 %v1651_v5, %v1567_v55 }
 0x381   : > { %1766 = vperm.xlu1 %1942, %v1652_v39  }
 0x383   : > { %v1697_v14 = vpop.permute.xlu1 %1696 }
 0x384   : > { %v1770_v4 = vsel %vm1674_vm2, %v1697_v14, 0.0 }
 0x385   : > { %v1785_v31 = vadd.f32 %v1770_v4, %v1769_v22 }
 0x387   : > { %v1786_v59 = vadd.f32 %v1785_v31, %v1771_v61 }
 0x389   : > { %v1787_v13 = vadd.f32 %v1786_v59, %v1772_v51 }
 0x38b   : > { %v1717_v47 = vpop.permute.xlu2 %1716 }
 0x38c   : > { %v1774_v12 = vsel %vm1678_vm7, %v1717_v47, 0.0  ;;  %vm1835_vm7 = vcmp.lt.s32.totalorder %v2532_v49, 8 }
 0x39b   : > { %v1712_v8 = vpop.permute.xlu0 %1711 }
 0x39c   : > { %v1773_v52 = vsel %vm1677_vm6, %v1712_v8, 0.0  ;;  %vm1836_vm6 = vcmp.eq.s32.totalorder %v2532_v49, 8 }
 0x39d   : > { %v1788_v56 = vadd.f32 %v1787_v13, %v1773_v52  ;;  %v1826_v13 = vld [vmem:[%s258_s20] sm:$0x1] }
 0x39f   : > { %v1789_v10 = vadd.f32 %v1788_v56, %v1774_v12  ;;  %v1830_v12 = vld [vmem:[%s2592_s4 + $0x1] sm:$0x1] }
 0x3a3   : > { %v1732_v17 = vpop.permute.xlu2 %1731 }
 0x3a4   : > { %v1777_v15 = vsel %vm1681_vm10, %v1732_v17, 0.0 }
 0x3ab   : > { %v1722_v2 = vpop.permute.xlu1 %1721 }
 0x3ac   : > { %v1775_v21 = vsel %vm1679_vm8, %v1722_v2, 0.0  ;;  %vm1834_vm8 = vcmp.lt.s32.totalorder %v2532_v49, 4 }
 0x3ad   : > { %v1790_v46 = vadd.f32 %v1789_v10, %v1775_v21 }
 0x3b3   : > { %v1727_v3 = vpop.permute.xlu0 %1726 }
 0x3b4   : > { %v1776_v37 = vsel %vm1680_vm9, %v1727_v3, 0.0 }
 0x3b5   : > { %v1791_v6 = vadd.f32 %v1790_v46, %v1776_v37 }
 0x3b7   : > { %v1792_v16 = vadd.f32 %v1791_v6, %v1777_v15 }
 0x3bb   : > { %v1747_v20 = vpop.permute.xlu2 %1746 }
 0x3bc   : > { %v1780_v40 = vsel %vm1684_vm13, %v1747_v20, 0.0 }
 0x3c3   : > { %v1737_v38 = vpop.permute.xlu1 %1736 }
 0x3c4   : > { %v1778_v26 = vsel %vm1682_vm11, %v1737_v38, 0.0 }
 0x3c5   : > { %v1793_v9 = vadd.f32 %v1792_v16, %v1778_v26 }
 0x3cb   : > { %v1742_v63 = vpop.permute.xlu0 %1741 }
 0x3cc   : > { %v1779_v11 = vsel %vm1683_vm12, %v1742_v63, 0.0 }
 0x3cd   : > { %v1794_v23 = vadd.f32 %v1793_v9, %v1779_v11 }
 0x3cf   : > { %v1795_v28 = vadd.f32 %v1794_v23, %v1780_v40 }
 0x3d3   : > { %v1762_v54 = vpop.permute.xlu2 %1761 }
 0x3d4   : > { %v1783_v35 = vsel %vm1687_vm0, %v1762_v54, 0.0 }
 0x3db   : > { %v1752_v1 = vpop.permute.xlu1 %1751 }
 0x3dc   : > { %v1781_v41 = vsel %vm1685_vm14, %v1752_v1, 0.0 }
 0x3dd   : > { %v1796_v30 = vadd.f32 %v1795_v28, %v1781_v41 }
 0x3e3   : > { %v1757_v48 = vpop.permute.xlu0 %1756 }
 0x3e4   : > { %v1782_v62 = vsel %vm1686_vm15, %v1757_v48, 0.0 }
 0x3e5   : > { %v1797_v29 = vadd.f32 %v1796_v30, %v1782_v62 }
 0x3e7   : > { %v1798_v55 = vadd.f32 %v1797_v29, %v1783_v35 }
 0x3f3   : > { %v1767_v5 = vpop.permute.xlu1 %1766 }
 0x3f4   : > { %v1784_v39 = vsel %vm1688_vm1, %v1767_v5, 0.0 }
 0x3f5   : > { %v1799_v43 = vadd.f32 %v1798_v55, %v1784_v39 }
 0x3f7   : > { %v1800_v57 = vrot.slane %v1799_v43, 4 }
 0x3f9   : > { %v1801_v50 = vadd.f32 %v1800_v57, %v1799_v43 }
 0x3fb   : > { %v1802_v14 = vrot.slane %v1801_v50, 2 }
 0x3fd   : > { %v1803_v0 = vadd.f32 %v1802_v14, %v1801_v50 }
 0x3ff   : > { %v1804_v44 = vrot.slane %v1803_v0, 1 }
 0x401   : > { %v1805_v4 = vadd.f32 %v1804_v44, %v1803_v0 }
 0x403   : > { %v1807_v22 = vadd.f32 %v1806_v45, %v1805_v4 }
 0x405   : > { %v1808_v58 = vsub.f32 0.0, %v1807_v22  ;;  %v1837_v37 = vsel %vm1836_vm6, %v1807_v22, 0.0 }
 0x407   : > { %v1809_v31 = vmul.f32 1.442695, %v1808_v58 }
 0x409   : > { %1944 = vpow2.f32 %v1809_v31 }
 0x40f   : > { %v1945_v42 = vpop.eup %1944 }
 0x410   : > { %v1811_v53 = vadd.f32 1.0, %v1945_v42 }
 0x412   : > { %1946 = vrcp.f32 %v1811_v53  ;;  %v1823_v18 = vand.u32 2147483648, %v1811_v53  ;;  %v1821_v51 = vand.u32 2147483647, %v1811_v53  ;;  %vm1817_vm3 = vweird.f32 %v1811_v53 }
 0x414   : > { %v1824_v36 = vor.u32 1.1754944e-38, %v1823_v18  ;;  %vm1822_vm5 = vcmp.eq.f32.partialorder %v1821_v51, 8.507059e+37 }
 0x418   : > { %v1947_v61 = vpop.eup %1946 }
 0x419   : > { %v1813_v59 = vmul.f32 %v1947_v61, %v1811_v53  ;;  %vm1818_vm2 = vweird.f32 %v1947_v61 }
 0x41a   : > { %vm1819_vm4 = vmor %vm1817_vm3, %vm1818_vm2 }
 0x41b   : > { %v1814_v8 = vsub.f32 1.0, %v1813_v59 }
 0x41d   : > { %v1815_v25 = vmul.f32 %v1947_v61, %v1814_v8 }
 0x41f   : > { %v1816_v52 = vadd.f32 %v1947_v61, %v1815_v25 }
 0x421   : > { %v1820_v47 = vsel %vm1819_vm4, %v1947_v61, %v1816_v52 }
 0x422   : > { %v1825_v56 = vsel %vm1822_vm5, %v1824_v36, %v1820_v47 }
 0x423   : > { %v1827_v2 = vsub.f32 %v1826_v13, %v1825_v56 }
 0x425   : > { %v1828_v3 = vmul.f32 %v1827_v2, %v1827_v2 }
 0x427   : > { %v1829_v21 = vsub.f32 0.0, %v1828_v3 }
 0x429   : > { %v1831_v10 = vmul.f32 %v1830_v12, %v1829_v21 }
 0x42b   : > { %v1833_v7 = vadd.f32 %v1832_v27, %v1831_v10 }
 0x42d   : > { %v1838_v46 = vsel %vm1835_vm7, %v1833_v7, %v1837_v37 }
 0x42e   : > { %v1839_v60 = vsel %vm1834_vm8, %v1826_v13, %v1838_v46 }
 0x42f   : > { %1840 = vst [vmem:[%s261_s29] sm:$0x1] %v1839_v60 }
 0x430 PF: > { %s16_s21 = sadd.s32 1, %s1954_s21  }
 0x431   : > { %p13_p4 = scmp.ge.s32.totalorder %s16_s21, 4  }
 0x433   :  { %15 = sbr.rel (!%p13_p4) target bundleno = 1 (0x1), region = 81 }

</bundles_post_ra>
